<compile_context>
chip_gen: v7x
topology: tpu7x:2x2x1
jax: 0.10.0
libtpu: 0.0.40
codegen_flags: <defaults>
</compile_context>

<pallas_src>
import functools

import jax
import jax.numpy as jnp
from jax import lax
from jax.experimental import pallas as pl
from jax.experimental.pallas import tpu as pltpu


def _silu(y):
    # exp and reciprocal both issue on the EUP slot (otherwise idle here).
    return y * pl.reciprocal(1.0 + jnp.exp(-y), approx=False)


def _dsconv_kernel(x_ref, w1_ref, b1_ref, wd_ref, b2_ref, w3_ref, b3_ref,
                   out_ref, pad_ref, *, H, W, use_res):
    # x_ref  : (Rin, L)        batch-folded channel-major image rows, L = H*W
    # w1_ref : (Rhid, Rin)     1x1 grouped conv as batch+group block-diag, BN1 folded
    # b1_ref : (Rhid, 1)       BN1 shift
    # wd_ref : (Rhid, 9)       3x3 depthwise taps (row-major dy,dx), BN2 scale folded
    # b2_ref : (Rhid, 1)       BN2 shift
    # w3_ref : (Rout, Rhid)    1x1 grouped conv as batch+group block-diag, BN3 folded
    # b3_ref : (Rout, 1)       BN3 shift
    # out_ref: (Rout, L)       lane-dense output
    # pad_ref: (Rhid, L+2*PAD) VMEM scratch; PAD zero lanes each side handle dy taps
    L = H * W
    PAD = (pad_ref.shape[1] - L) // 2
    Rhid = w1_ref.shape[0]

    x = x_ref[...]                                                       # (Rin, L)

    # ---- 1x1 grouped conv (one contiguous dot, whole batch) + BN1 + SiLU ----
    y1 = jnp.dot(w1_ref[...], x, preferred_element_type=jnp.float32)     # (Rhid, L)
    y1 = _silu(y1 + b1_ref[...])

    # ---- 3x3 depthwise conv (stride 1, pad 1) + BN2 + SiLU -------------------
    # Zero pad lanes (vertical taps read zeros); lane masks fix horizontal wrap.
    zpad = jnp.zeros((Rhid, PAD), jnp.float32)
    pad_ref[:, :PAD] = zpad                  # re-zeroed every call: scratch persists
    pad_ref[:, PAD + L:] = zpad
    pad_ref[:, PAD:PAD + L] = y1             # PAD is a multiple of 128 -> aligned store

    lane = lax.broadcasted_iota(jnp.int32, (Rhid, L), 1)
    wpos = lane % W
    ok_left = wpos >= 1                      # dx == -1 valid only when w-1 >= 0
    ok_right = wpos <= W - 2                 # dx == +1 valid only when w+1 <  W

    acc = jnp.zeros((Rhid, L), jnp.float32)
    k = 0
    for dy in (-1, 0, 1):
        for dx in (-1, 0, 1):
            start = PAD + dy * W + dx
            shifted = pad_ref[:, start:start + L]        # static lane-offset load
            if dx == -1:
                shifted = jnp.where(ok_left, shifted, 0.0)
            elif dx == 1:
                shifted = jnp.where(ok_right, shifted, 0.0)
            acc = acc + shifted * wd_ref[:, k:k + 1]     # per-row broadcast MAC
            k += 1
    y2 = _silu(acc + b2_ref[...])

    # ---- 1x1 grouped conv (one contiguous dot) + BN3 (+ residual) -----------
    y3 = jnp.dot(w3_ref[...], y2, preferred_element_type=jnp.float32)    # (Rout, L)
    y3 = y3 + b3_ref[...]
    if use_res:
        y3 = y3 + x
    out_ref[...] = y3                        # (Rout, 256): fully lane-dense store


def _block_diag(w_g, groups):
    """(Cout, Cin_per_group) grouped 1x1 weight -> dense block-diagonal (Cout, Cin)."""
    cout, cinpg = w_g.shape
    coutpg = cout // groups
    w = jnp.zeros((cout, cinpg * groups), w_g.dtype)
    for g in range(groups):
        w = w.at[g * coutpg:(g + 1) * coutpg,
                 g * cinpg:(g + 1) * cinpg].set(w_g[g * coutpg:(g + 1) * coutpg, :])
    return w


def ds_conv_block(x_nchw, params, *, stride=1, groups=4, eps=1e-5):
    """Forward of DSConvBlock (eval mode). x_nchw: (N, Cin, H, W) float32."""
    (w1, g1, be1, m1, v1, wd, g2, be2, m2, v2, w3, g3, be3, m3, v3) = params
    assert stride == 1  # TODO(synk): stride=2 path not implemented
    N, Cin, H, W = x_nchw.shape
    Chid = w1.shape[0]
    Cout = w3.shape[0]
    L = H * W
    use_res = (stride == 1 and Cin == Cout)

    # Batch-folded channel-major flattened layout: free reshape from NCHW.
    x = x_nchw.reshape(N * Cin, L).astype(jnp.float32)

    # Fold eval-mode BN scale into the conv weights; keep shift as a bias.
    s1 = (g1 / jnp.sqrt(v1 + eps)).astype(jnp.float32)
    w1f = _block_diag(w1[:, :, 0, 0].astype(jnp.float32), groups) * s1[:, None]
    b1 = (be1 - m1 * s1).astype(jnp.float32)[:, None]

    s2 = (g2 / jnp.sqrt(v2 + eps)).astype(jnp.float32)
    wdf = wd.reshape(Chid, 9).astype(jnp.float32) * s2[:, None]
    b2 = (be2 - m2 * s2).astype(jnp.float32)[:, None]

    s3 = (g3 / jnp.sqrt(v3 + eps)).astype(jnp.float32)
    w3f = _block_diag(w3[:, :, 0, 0].astype(jnp.float32), groups) * s3[:, None]
    b3 = (be3 - m3 * s3).astype(jnp.float32)[:, None]

    # Fold the batch into the weight rows: kron(I_N, W) keeps every (batch, channel)
    # row independent while letting one MXU dot process the whole batch.
    eye = jnp.eye(N, dtype=jnp.float32)
    w1b = jnp.kron(eye, w1f)                 # (N*Chid, N*Cin)
    w3b = jnp.kron(eye, w3f)                 # (N*Cout, N*Chid)
    b1b = jnp.tile(b1, (N, 1))
    b2b = jnp.tile(b2, (N, 1))
    b3b = jnp.tile(b3, (N, 1))
    wdb = jnp.tile(wdf, (N, 1))

    Rin, Rhid, Rout = N * Cin, N * Chid, N * Cout
    PAD = 128  # multiple of 128 -> aligned stores into the padded scratch
    kernel = functools.partial(_dsconv_kernel, H=H, W=W, use_res=use_res)
    out = pl.pallas_call(
        kernel,
        out_shape=jax.ShapeDtypeStruct((Rout, L), jnp.float32),
        grid=(1,),
        in_specs=[
            pl.BlockSpec((Rin, L), lambda i: (0, 0)),
            pl.BlockSpec((Rhid, Rin), lambda i: (0, 0)),
            pl.BlockSpec((Rhid, 1), lambda i: (0, 0)),
            pl.BlockSpec((Rhid, 9), lambda i: (0, 0)),
            pl.BlockSpec((Rhid, 1), lambda i: (0, 0)),
            pl.BlockSpec((Rout, Rhid), lambda i: (0, 0)),
            pl.BlockSpec((Rout, 1), lambda i: (0, 0)),
        ],
        out_specs=pl.BlockSpec((Rout, L), lambda i: (0, 0)),
        scratch_shapes=[pltpu.VMEM((Rhid, L + 2 * PAD), jnp.float32)],
        compiler_params=pltpu.CompilerParams(dimension_semantics=("arbitrary",)),
    )(x, w1b, b1b, wdb, b2b, w3b, b3b)

    return out.reshape(N, Cout, H, W)


def _reference(x, params, *, stride=1, groups=4, eps=1e-5):
    """Pure-JAX reference of the same forward (NCHW, eval-mode BN)."""
    (w1, g1, be1, m1, v1, wd, g2, be2, m2, v2, w3, g3, be3, m3, v3) = params

    def bn(y, g, b, m, v):
        s = g / jnp.sqrt(v + eps)
        return y * s[None, :, None, None] + (b - m * s)[None, :, None, None]

    dn = ("NCHW", "OIHW", "NCHW")
    hid = w1.shape[0]
    y = lax.conv_general_dilated(x, w1, (1, 1), ((0, 0), (0, 0)),
                                 dimension_numbers=dn, feature_group_count=groups)
    y = jax.nn.silu(bn(y, g1, be1, m1, v1))
    y = lax.conv_general_dilated(y, wd, (stride, stride), ((1, 1), (1, 1)),
                                 dimension_numbers=dn, feature_group_count=hid)
    y = jax.nn.silu(bn(y, g2, be2, m2, v2))
    y = lax.conv_general_dilated(y, w3, (1, 1), ((0, 0), (0, 0)),
                                 dimension_numbers=dn, feature_group_count=groups)
    y = bn(y, g3, be3, m3, v3)
    if stride == 1 and x.shape[1] == y.shape[1]:
        return x + y
    return y


if __name__ == "__main__":
    # Module config: inp = oup = 8, stride 1, groups 4, expansion 4 -> hidden 32.
    N, C, H, W = 2, 8, 16, 16
    groups, expansion = 4, 4
    Chid = C * expansion

    key = jax.random.PRNGKey(0)
    ks = jax.random.split(key, 8)

    x = jax.random.normal(ks[0], (N, C, H, W), jnp.float32)
    w1 = jax.random.normal(ks[1], (Chid, C // groups, 1, 1), jnp.float32) * 0.3
    wd = jax.random.normal(ks[2], (Chid, 1, 3, 3), jnp.float32) * 0.3
    w3 = jax.random.normal(ks[3], (C, Chid // groups, 1, 1), jnp.float32) * 0.3

    def bn_params(k, c):
        k1, k2, k3, k4 = jax.random.split(k, 4)
        gamma = 1.0 + 0.1 * jax.random.normal(k1, (c,), jnp.float32)
        beta = 0.1 * jax.random.normal(k2, (c,), jnp.float32)
        mean = 0.1 * jax.random.normal(k3, (c,), jnp.float32)
        var = 0.5 + jnp.abs(jax.random.normal(k4, (c,), jnp.float32))
        return gamma, beta, mean, var

    g1, be1, m1, v1 = bn_params(ks[4], Chid)
    g2, be2, m2, v2 = bn_params(ks[5], Chid)
    g3, be3, m3, v3 = bn_params(ks[6], C)
    params = (w1, g1, be1, m1, v1, wd, g2, be2, m2, v2, w3, g3, be3, m3, v3)

    out = ds_conv_block(x, params, stride=1, groups=groups)
    out = jax.block_until_ready(out)

    ref = _reference(x, params, stride=1, groups=groups)
    assert out.shape == (N, C, H, W)
    err = float(jnp.max(jnp.abs(out - ref)))
    assert jnp.allclose(out, ref, rtol=1e-3, atol=1e-3), f"mismatch vs reference: {err}"

    print("KERNEL_OK")
</pallas_src>

<mosaic_0001>
module attributes {stable_mosaic.version = 11 : i64} {
  func.func @_dsconv_kernel(%arg0: i32, %arg1: memref<16x256xf32, #tpu.memory_space<vmem>>, %arg2: memref<64x16xf32, #tpu.memory_space<vmem>>, %arg3: memref<64x1xf32, #tpu.memory_space<vmem>>, %arg4: memref<64x9xf32, #tpu.memory_space<vmem>>, %arg5: memref<64x1xf32, #tpu.memory_space<vmem>>, %arg6: memref<16x64xf32, #tpu.memory_space<vmem>>, %arg7: memref<16x1xf32, #tpu.memory_space<vmem>>, %arg8: memref<16x256xf32, #tpu.memory_space<vmem>>, %arg9: memref<64x512xf32, #tpu.memory_space<vmem>>) attributes {dimension_semantics = [#tpu.dimension_semantics<arbitrary>], iteration_bounds = array<i64: 1>, scalar_prefetch = 0 : i64, scratch_operands = 1 : i64, tpu.core_type = #tpu.core_type<tc>, window_params = [{pipeline_mode = #tpu.pipeline_mode<synchronous>, transform_indices = @transform_0, window_bounds = array<i64: 16, 256>}, {pipeline_mode = #tpu.pipeline_mode<synchronous>, transform_indices = @transform_1, window_bounds = array<i64: 64, 16>}, {pipeline_mode = #tpu.pipeline_mode<synchronous>, transform_indices = @transform_2, window_bounds = array<i64: 64, 1>}, {pipeline_mode = #tpu.pipeline_mode<synchronous>, transform_indices = @transform_3, window_bounds = array<i64: 64, 9>}, {pipeline_mode = #tpu.pipeline_mode<synchronous>, transform_indices = @transform_4, window_bounds = array<i64: 64, 1>}, {pipeline_mode = #tpu.pipeline_mode<synchronous>, transform_indices = @transform_5, window_bounds = array<i64: 16, 64>}, {pipeline_mode = #tpu.pipeline_mode<synchronous>, transform_indices = @transform_6, window_bounds = array<i64: 16, 1>}, {pipeline_mode = #tpu.pipeline_mode<synchronous>, transform_indices = @transform_7, window_bounds = array<i64: 16, 256>}]} {
    %c0 = arith.constant 0 : index
    %c0_0 = arith.constant 0 : index
    %0 = vector.load %arg1[%c0, %c0_0] : memref<16x256xf32, #tpu.memory_space<vmem>>, vector<16x256xf32>
    %c0_1 = arith.constant 0 : index
    %c0_2 = arith.constant 0 : index
    %1 = vector.load %arg2[%c0_1, %c0_2] : memref<64x16xf32, #tpu.memory_space<vmem>>, vector<64x16xf32>
    %cst = arith.constant dense<0.000000e+00> : vector<64x256xf32>
    %2 = tpu.matmul %1, %0, %cst {dimension_numbers = #tpu.dot_dimension_numbers<[1], [0], [0], [1], [0, 0, 1, 1], [], []>} : vector<64x16xf32>, vector<16x256xf32>, vector<64x256xf32> -> vector<64x256xf32>
    %c0_3 = arith.constant 0 : index
    %c0_4 = arith.constant 0 : index
    %3 = vector.load %arg3[%c0_3, %c0_4] : memref<64x1xf32, #tpu.memory_space<vmem>>, vector<64x1xf32>
    %4 = vector.broadcast %3 : vector<64x1xf32> to vector<64x256xf32>
    %5 = arith.addf %2, %4 : vector<64x256xf32>
    %cst_5 = arith.constant 0.000000e+00 : f32
    %6 = vector.broadcast %cst_5 : f32 to vector<64x256xf32>
    %7 = arith.subf %6, %5 : vector<64x256xf32>
    %8 = math.exp %7 : vector<64x256xf32>
    %cst_6 = arith.constant 1.000000e+00 : f32
    %9 = vector.broadcast %cst_6 : f32 to vector<64x256xf32>
    %10 = arith.addf %9, %8 : vector<64x256xf32>
    %11 = tpu.reciprocal %10 : vector<64x256xf32> -> vector<64x256xf32>
    %12 = arith.mulf %5, %11 : vector<64x256xf32>
    %cst_7 = arith.constant 0.000000e+00 : f32
    %13 = vector.broadcast %cst_7 : f32 to vector<64x128xf32>
    %c0_8 = arith.constant 0 : index
    %c0_9 = arith.constant 0 : index
    %14 = vector.load %arg9[%c0_8, %c0_9] : memref<64x512xf32, #tpu.memory_space<vmem>>, vector<64x128xf32>
    tpu.vector_store %arg9[%c0_8, %c0_9], %13 {strides = array<i32>} : memref<64x512xf32, #tpu.memory_space<vmem>>, vector<64x128xf32>,
    %c0_10 = arith.constant 0 : index
    %c384 = arith.constant 384 : index
    %15 = vector.load %arg9[%c0_10, %c384] : memref<64x512xf32, #tpu.memory_space<vmem>>, vector<64x128xf32>
    tpu.vector_store %arg9[%c0_10, %c384], %13 {strides = array<i32>} : memref<64x512xf32, #tpu.memory_space<vmem>>, vector<64x128xf32>,
    %c0_11 = arith.constant 0 : index
    %c128 = arith.constant 128 : index
    %16 = vector.load %arg9[%c0_11, %c128] : memref<64x512xf32, #tpu.memory_space<vmem>>, vector<64x256xf32>
    tpu.vector_store %arg9[%c0_11, %c128], %12 {strides = array<i32>} : memref<64x512xf32, #tpu.memory_space<vmem>>, vector<64x256xf32>,
    %17 = tpu.iota {dimensions = array<i32: 1>} : vector<64x256xi32>
    %c16_i32 = arith.constant 16 : i32
    %c0_i32 = arith.constant 0 : i32
    %18 = arith.cmpi eq, %c16_i32, %c0_i32 : i32
    %c1_i32 = arith.constant 1 : i32
    %19 = arith.select %18, %c1_i32, %c16_i32 : i32
    %20 = vector.broadcast %19 : i32 to vector<64x256xi32>
    %21 = arith.remsi %17, %20 : vector<64x256xi32>
    %c0_i32_12 = arith.constant 0 : i32
    %22 = vector.broadcast %c0_i32_12 : i32 to vector<64x256xi32>
    %23 = arith.cmpi ne, %21, %22 : vector<64x256xi32>
    %c0_i32_13 = arith.constant 0 : i32
    %24 = vector.broadcast %c0_i32_13 : i32 to vector<64x256xi32>
    %25 = arith.cmpi slt, %21, %24 : vector<64x256xi32>
    %c0_i32_14 = arith.constant 0 : i32
    %26 = arith.cmpi slt, %19, %c0_i32_14 : i32
    %27 = vector.broadcast %26 : i1 to vector<64x256xi1>
    %28 = vector.broadcast %27 : vector<64x256xi1> to vector<64x256xi1>
    %29 = arith.xori %25, %28 : vector<64x256xi1>
    %30 = arith.andi %29, %23 : vector<64x256xi1>
    %31 = vector.broadcast %19 : i32 to vector<64x256xi32>
    %32 = arith.addi %21, %31 : vector<64x256xi32>
    %33 = arith.select %30, %32, %21 : vector<64x256xi1>, vector<64x256xi32>
    %c1_i32_15 = arith.constant 1 : i32
    %34 = vector.broadcast %c1_i32_15 : i32 to vector<64x256xi32>
    %35 = arith.cmpi sge, %33, %34 : vector<64x256xi32>
    %c14_i32 = arith.constant 14 : i32
    %36 = vector.broadcast %c14_i32 : i32 to vector<64x256xi32>
    %37 = arith.cmpi sle, %33, %36 : vector<64x256xi32>
    %cst_16 = arith.constant 0.000000e+00 : f32
    %38 = vector.broadcast %cst_16 : f32 to vector<64x256xf32>
    %c0_17 = arith.constant 0 : index
    %c111 = arith.constant 111 : index
    %39 = vector.load %arg9[%c0_17, %c111] : memref<64x512xf32, #tpu.memory_space<vmem>>, vector<64x256xf32>
    %cst_18 = arith.constant 0.000000e+00 : f32
    %40 = vector.broadcast %cst_18 : f32 to vector<64x256xf32>
    %41 = arith.select %35, %39, %40 : vector<64x256xi1>, vector<64x256xf32>
    %c0_19 = arith.constant 0 : index
    %c0_20 = arith.constant 0 : index
    %42 = vector.load %arg4[%c0_19, %c0_20] : memref<64x9xf32, #tpu.memory_space<vmem>>, vector<64x1xf32>
    %43 = vector.broadcast %42 : vector<64x1xf32> to vector<64x256xf32>
    %44 = arith.mulf %41, %43 : vector<64x256xf32>
    %45 = arith.addf %38, %44 : vector<64x256xf32>
    %c0_21 = arith.constant 0 : index
    %c112 = arith.constant 112 : index
    %46 = vector.load %arg9[%c0_21, %c112] : memref<64x512xf32, #tpu.memory_space<vmem>>, vector<64x256xf32>
    %c0_22 = arith.constant 0 : index
    %c1 = arith.constant 1 : index
    %47 = vector.load %arg4[%c0_22, %c1] : memref<64x9xf32, #tpu.memory_space<vmem>>, vector<64x1xf32>
    %48 = vector.broadcast %47 : vector<64x1xf32> to vector<64x256xf32>
    %49 = arith.mulf %46, %48 : vector<64x256xf32>
    %50 = arith.addf %45, %49 : vector<64x256xf32>
    %c0_23 = arith.constant 0 : index
    %c113 = arith.constant 113 : index
    %51 = vector.load %arg9[%c0_23, %c113] : memref<64x512xf32, #tpu.memory_space<vmem>>, vector<64x256xf32>
    %cst_24 = arith.constant 0.000000e+00 : f32
    %52 = vector.broadcast %cst_24 : f32 to vector<64x256xf32>
    %53 = arith.select %37, %51, %52 : vector<64x256xi1>, vector<64x256xf32>
    %c0_25 = arith.constant 0 : index
    %c2 = arith.constant 2 : index
    %54 = vector.load %arg4[%c0_25, %c2] : memref<64x9xf32, #tpu.memory_space<vmem>>, vector<64x1xf32>
    %55 = vector.broadcast %54 : vector<64x1xf32> to vector<64x256xf32>
    %56 = arith.mulf %53, %55 : vector<64x256xf32>
    %57 = arith.addf %50, %56 : vector<64x256xf32>
    %c0_26 = arith.constant 0 : index
    %c127 = arith.constant 127 : index
    %58 = vector.load %arg9[%c0_26, %c127] : memref<64x512xf32, #tpu.memory_space<vmem>>, vector<64x256xf32>
    %cst_27 = arith.constant 0.000000e+00 : f32
    %59 = vector.broadcast %cst_27 : f32 to vector<64x256xf32>
    %60 = arith.select %35, %58, %59 : vector<64x256xi1>, vector<64x256xf32>
    %c0_28 = arith.constant 0 : index
    %c3 = arith.constant 3 : index
    %61 = vector.load %arg4[%c0_28, %c3] : memref<64x9xf32, #tpu.memory_space<vmem>>, vector<64x1xf32>
    %62 = vector.broadcast %61 : vector<64x1xf32> to vector<64x256xf32>
    %63 = arith.mulf %60, %62 : vector<64x256xf32>
    %64 = arith.addf %57, %63 : vector<64x256xf32>
    %c0_29 = arith.constant 0 : index
    %c128_30 = arith.constant 128 : index
    %65 = vector.load %arg9[%c0_29, %c128_30] : memref<64x512xf32, #tpu.memory_space<vmem>>, vector<64x256xf32>
    %c0_31 = arith.constant 0 : index
    %c4 = arith.constant 4 : index
    %66 = vector.load %arg4[%c0_31, %c4] : memref<64x9xf32, #tpu.memory_space<vmem>>, vector<64x1xf32>
    %67 = vector.broadcast %66 : vector<64x1xf32> to vector<64x256xf32>
    %68 = arith.mulf %65, %67 : vector<64x256xf32>
    %69 = arith.addf %64, %68 : vector<64x256xf32>
    %c0_32 = arith.constant 0 : index
    %c129 = arith.constant 129 : index
    %70 = vector.load %arg9[%c0_32, %c129] : memref<64x512xf32, #tpu.memory_space<vmem>>, vector<64x256xf32>
    %cst_33 = arith.constant 0.000000e+00 : f32
    %71 = vector.broadcast %cst_33 : f32 to vector<64x256xf32>
    %72 = arith.select %37, %70, %71 : vector<64x256xi1>, vector<64x256xf32>
    %c0_34 = arith.constant 0 : index
    %c5 = arith.constant 5 : index
    %73 = vector.load %arg4[%c0_34, %c5] : memref<64x9xf32, #tpu.memory_space<vmem>>, vector<64x1xf32>
    %74 = vector.broadcast %73 : vector<64x1xf32> to vector<64x256xf32>
    %75 = arith.mulf %72, %74 : vector<64x256xf32>
    %76 = arith.addf %69, %75 : vector<64x256xf32>
    %c0_35 = arith.constant 0 : index
    %c143 = arith.constant 143 : index
    %77 = vector.load %arg9[%c0_35, %c143] : memref<64x512xf32, #tpu.memory_space<vmem>>, vector<64x256xf32>
    %cst_36 = arith.constant 0.000000e+00 : f32
    %78 = vector.broadcast %cst_36 : f32 to vector<64x256xf32>
    %79 = arith.select %35, %77, %78 : vector<64x256xi1>, vector<64x256xf32>
    %c0_37 = arith.constant 0 : index
    %c6 = arith.constant 6 : index
    %80 = vector.load %arg4[%c0_37, %c6] : memref<64x9xf32, #tpu.memory_space<vmem>>, vector<64x1xf32>
    %81 = vector.broadcast %80 : vector<64x1xf32> to vector<64x256xf32>
    %82 = arith.mulf %79, %81 : vector<64x256xf32>
    %83 = arith.addf %76, %82 : vector<64x256xf32>
    %c0_38 = arith.constant 0 : index
    %c144 = arith.constant 144 : index
    %84 = vector.load %arg9[%c0_38, %c144] : memref<64x512xf32, #tpu.memory_space<vmem>>, vector<64x256xf32>
    %c0_39 = arith.constant 0 : index
    %c7 = arith.constant 7 : index
    %85 = vector.load %arg4[%c0_39, %c7] : memref<64x9xf32, #tpu.memory_space<vmem>>, vector<64x1xf32>
    %86 = vector.broadcast %85 : vector<64x1xf32> to vector<64x256xf32>
    %87 = arith.mulf %84, %86 : vector<64x256xf32>
    %88 = arith.addf %83, %87 : vector<64x256xf32>
    %c0_40 = arith.constant 0 : index
    %c145 = arith.constant 145 : index
    %89 = vector.load %arg9[%c0_40, %c145] : memref<64x512xf32, #tpu.memory_space<vmem>>, vector<64x256xf32>
    %cst_41 = arith.constant 0.000000e+00 : f32
    %90 = vector.broadcast %cst_41 : f32 to vector<64x256xf32>
    %91 = arith.select %37, %89, %90 : vector<64x256xi1>, vector<64x256xf32>
    %c0_42 = arith.constant 0 : index
    %c8 = arith.constant 8 : index
    %92 = vector.load %arg4[%c0_42, %c8] : memref<64x9xf32, #tpu.memory_space<vmem>>, vector<64x1xf32>
    %93 = vector.broadcast %92 : vector<64x1xf32> to vector<64x256xf32>
    %94 = arith.mulf %91, %93 : vector<64x256xf32>
    %95 = arith.addf %88, %94 : vector<64x256xf32>
    %c0_43 = arith.constant 0 : index
    %c0_44 = arith.constant 0 : index
    %96 = vector.load %arg5[%c0_43, %c0_44] : memref<64x1xf32, #tpu.memory_space<vmem>>, vector<64x1xf32>
    %97 = vector.broadcast %96 : vector<64x1xf32> to vector<64x256xf32>
    %98 = arith.addf %95, %97 : vector<64x256xf32>
    %cst_45 = arith.constant 0.000000e+00 : f32
    %99 = vector.broadcast %cst_45 : f32 to vector<64x256xf32>
    %100 = arith.subf %99, %98 : vector<64x256xf32>
    %101 = math.exp %100 : vector<64x256xf32>
    %cst_46 = arith.constant 1.000000e+00 : f32
    %102 = vector.broadcast %cst_46 : f32 to vector<64x256xf32>
    %103 = arith.addf %102, %101 : vector<64x256xf32>
    %104 = tpu.reciprocal %103 : vector<64x256xf32> -> vector<64x256xf32>
    %105 = arith.mulf %98, %104 : vector<64x256xf32>
    %c0_47 = arith.constant 0 : index
    %c0_48 = arith.constant 0 : index
    %106 = vector.load %arg6[%c0_47, %c0_48] : memref<16x64xf32, #tpu.memory_space<vmem>>, vector<16x64xf32>
    %cst_49 = arith.constant dense<0.000000e+00> : vector<16x256xf32>
    %107 = tpu.matmul %106, %105, %cst_49 {dimension_numbers = #tpu.dot_dimension_numbers<[1], [0], [0], [1], [0, 0, 1, 1], [], []>} : vector<16x64xf32>, vector<64x256xf32>, vector<16x256xf32> -> vector<16x256xf32>
    %c0_50 = arith.constant 0 : index
    %c0_51 = arith.constant 0 : index
    %108 = vector.load %arg7[%c0_50, %c0_51] : memref<16x1xf32, #tpu.memory_space<vmem>>, vector<16x1xf32>
    %109 = vector.broadcast %108 : vector<16x1xf32> to vector<16x256xf32>
    %110 = arith.addf %107, %109 : vector<16x256xf32>
    %111 = arith.addf %110, %0 : vector<16x256xf32>
    %c0_52 = arith.constant 0 : index
    %c0_53 = arith.constant 0 : index
    %112 = vector.load %arg8[%c0_52, %c0_53] : memref<16x256xf32, #tpu.memory_space<vmem>>, vector<16x256xf32>
    tpu.vector_store %arg8[%c0_52, %c0_53], %111 {strides = array<i32>} : memref<16x256xf32, #tpu.memory_space<vmem>>, vector<16x256xf32>,
    return
  }
  func.func @transform_0(%arg0: i32) -> (i32, i32) {
    %c0_i32 = arith.constant 0 : i32
    %c0_i32_0 = arith.constant 0 : i32
    %c0_i32_1 = arith.constant 0 : i32
    return %c0_i32, %c0_i32_0 : i32, i32
  }
  func.func @transform_1(%arg0: i32) -> (i32, i32) {
    %c0_i32 = arith.constant 0 : i32
    %c0_i32_0 = arith.constant 0 : i32
    %c0_i32_1 = arith.constant 0 : i32
    return %c0_i32, %c0_i32_0 : i32, i32
  }
  func.func @transform_2(%arg0: i32) -> (i32, i32) {
    %c0_i32 = arith.constant 0 : i32
    %c0_i32_0 = arith.constant 0 : i32
    %c0_i32_1 = arith.constant 0 : i32
    return %c0_i32, %c0_i32_0 : i32, i32
  }
  func.func @transform_3(%arg0: i32) -> (i32, i32) {
    %c0_i32 = arith.constant 0 : i32
    %c0_i32_0 = arith.constant 0 : i32
    %c0_i32_1 = arith.constant 0 : i32
    return %c0_i32, %c0_i32_0 : i32, i32
  }
  func.func @transform_4(%arg0: i32) -> (i32, i32) {
    %c0_i32 = arith.constant 0 : i32
    %c0_i32_0 = arith.constant 0 : i32
    %c0_i32_1 = arith.constant 0 : i32
    return %c0_i32, %c0_i32_0 : i32, i32
  }
  func.func @transform_5(%arg0: i32) -> (i32, i32) {
    %c0_i32 = arith.constant 0 : i32
    %c0_i32_0 = arith.constant 0 : i32
    %c0_i32_1 = arith.constant 0 : i32
    return %c0_i32, %c0_i32_0 : i32, i32
  }
  func.func @transform_6(%arg0: i32) -> (i32, i32) {
    %c0_i32 = arith.constant 0 : i32
    %c0_i32_0 = arith.constant 0 : i32
    %c0_i32_1 = arith.constant 0 : i32
    return %c0_i32, %c0_i32_0 : i32, i32
  }
  func.func @transform_7(%arg0: i32) -> (i32, i32) {
    %c0_i32 = arith.constant 0 : i32
    %c0_i32_0 = arith.constant 0 : i32
    %c0_i32_1 = arith.constant 0 : i32
    return %c0_i32, %c0_i32_0 : i32, i32
  }
}

</mosaic_0001>

<bundles_post_ra>
// kernel: tpu_custom_call.1
= control target key start
LH: loop header
LB: loop body
LE: loop exit
PB: predicated region body
PF: predicated region fallthrough
CT: control target
= control target key end

     0   :  { %v4819_v3 = vmov 0   ;;  %v4823_v7 = vmov 0.0   ;;  %vm87_vm0 = vcmask 130048   ;;  %s4811_s0 = inlined_call_operand.vmem [shape: f32[16,256], index: 0, kind: input, shape index: {}]   ;;  %s4812_s1 = inlined_call_operand.vmem [shape: f32[64,16], index: 1, kind: input, shape index: {}]   ;;  %s4813_s2 = inlined_call_operand.vmem [shape: f32[64,1], index: 2, kind: input, shape index: {}]   ;;  %s4814_s3 = inlined_call_operand.vmem [shape: f32[64,9], index: 3, kind: input, shape index: {}]   ;;  %s4815_s4 = inlined_call_operand.vmem [shape: f32[64,1], index: 4, kind: input, shape index: {}]   ;;  %s4816_s5 = inlined_call_operand.vmem [shape: f32[16,64], index: 5, kind: input, shape index: {}]   ;;  %s4817_s6 = inlined_call_operand.vmem [shape: f32[16,1], index: 6, kind: input, shape index: {}]   ;;  %s4818_s7 = inlined_call_operand.hbm [shape: f32[16,256], index: 7, kind: output, shape index: {}]  }
   0x1   :  { %v41_v0 = vld [vmem:[%s4813_s2 + $0x10] sm:$0xff]  ;;  %v28_v1 = vld [vmem:[%s4811_s0 + $0x8] sm:$0xff]  ;;  %v30_v2 = vld [vmem:[%s4811_s0 + $0x18] sm:$0xff]  ;;  %2212 = vset.pattern.permute.xlu1 %v4819_v3  ;;  %176 = vmatprep.mubr.f32.mxu0 %v4823_v7 }
   0x2   :  { %v2171_v4 = vpack.c.bf16 %v30_v2, %v28_v1  ;;  %v27_v5 = vld [vmem:[%s4811_s0] sm:$0xff]  ;;  %v29_v6 = vld [vmem:[%s4811_s0 + $0x10] sm:$0xff]  ;;  %59 = vperm.xlu1 %2212, %v41_v0   ;;  %2211 = vset.pattern.permute.xlu0 %v4819_v3  ;;  %v42_v9 = vld [vmem:[%s4813_s2 + $0x18] sm:$0xff] }
   0x3   :  { %v2173_v8 = vpack.c.bf16 %v29_v6, %v27_v5  ;;  %v39_v10 = vld [vmem:[%s4813_s2] sm:$0xff]  ;;  %v40_v12 = vld [vmem:[%s4813_s2 + $0x8] sm:$0xff]  ;;  %2124 = vmatprep.mubr.f32.mxu1 %v4823_v7 }
   0x4   :  { %2172 = vmatprep.subr.bf16.mxu0 %v2171_v4  ;;  %v31_v11 = vld [vmem:[%s4812_s1] sm:$0xff]  ;;  %49 = vperm.xlu0 %2211, %v39_v10   ;;  %v44_v13 = vld [vmem:[%s4813_s2 + $0x28] sm:$0xff] }
   0x5   :  { %2174 = vmatpush1.bf16.msra.mxu0 %v2173_v8  ;;  %v32_v14 = vld [vmem:[%s4812_s1 + $0x8] sm:$0xff]  ;;  %v43_v15 = vld [vmem:[%s4813_s2 + $0x20] sm:$0xff] }
   0x6   :  { %64 = vperm.xlu1 %2212, %v42_v9  }
   0x8   :  { %2161 = vmatmul.mubr.msk.f32.vlgmr.msra.gmra.mrb[0].mxu0 %vm87_vm0, %v31_v11  ;;  %54 = vperm.xlu0 %2211, %v40_v12  }
   0x9   :  { %182 = vmatprep.mubr.f32.mxu0 %v4823_v7 }
   0xa   :  { %12 = vsyncpa [#allocation4], 0  ;;  %74 = vperm.xlu1 %2212, %v44_v13   ;;  %v46_v16 = vld [vmem:[%s4813_s2 + $0x38] sm:$0xff]  ;;  %v33_v17 = vld [vmem:[%s4812_s1 + $0x10] sm:$0xff]  ;;  %s2531_s10 = smov 17   ;;  %v2532_v21 = vmov 1  }
   0xb   :  { %v45_v18 = vld [vmem:[%s4813_s2 + $0x30] sm:$0xff]  ;;  %v34_v19 = vld [vmem:[%s4812_s1 + $0x18] sm:$0xff]  ;;  %v35_v20 = vld [vmem:[%s4812_s1 + $0x20] sm:$0xff]  ;;  %s2533_s29 = smov 15   ;;  %v2534_v31 = vmov 2   ;;  %s2535_s2 = smov 1  }
   0xc   :  { %2162 = vmatmul.mubr.msk.f32.gmra.mrb[2].mxu0 %vm87_vm0, %v32_v14  ;;  %69 = vperm.xlu0 %2211, %v43_v15   ;;  %v2662_v22 = vld [vmem:[%s4814_s3 + $0x8] sm:$0xff]  ;;  %v2673_v24 = vld [vmem:[%s4814_s3] sm:$0xff]  ;;  %v2680_v25 = vld [vmem:[%s4814_s3 + $0x18] sm:$0xff]  ;;  %v2536_v34 = vmov 7   ;;  %v2537_v35 = vmov 3   ;;  %s2538_s12 = smov 16  }
   0xd   :  { %188 = vmatprep.mubr.f32.mxu0 %v4823_v7  ;;  %v36_v23 = vld [vmem:[%s4812_s1 + $0x28] sm:$0xff]  ;;  %v37_v26 = vld [vmem:[%s4812_s1 + $0x30] sm:$0xff]  ;;  %v38_v28 = vld [vmem:[%s4812_s1 + $0x38] sm:$0xff]  ;;  %v4821_v5 = vmov 4   ;;  %s2543_s13 = smov 113   ;;  %s2545_s14 = smov 111  }
   0xe   :  { %84 = vperm.xlu1 %2212, %v46_v16   ;;  %v2692_v27 = vld [vmem:[%s4814_s3 + $0x28] sm:$0xff]  ;;  %v2704_v29 = vld [vmem:[%s4814_s3 + $0x38] sm:$0xff]  ;;  %v2713_v30 = vld [vmem:[%s4814_s3 + $0x10] sm:$0xff]  ;;  %s2546_s15 = smov 112   ;;  %vm480_vm1 = vcmask 138240   ;;  %vm833_vm3 = vcmask 121856  }
   0xf   :  { %v2721_v32 = vld [vmem:[%s4814_s3 + $0x20] sm:$0xff]  ;;  %v2729_v33 = vld [vmem:[%s4814_s3 + $0x30] sm:$0xff]  ;;  %vm994_vm5 = vcmask 7168   ;;  %vm1428_vm6 = vcmask 924672   ;;  %vm1267_vm7 = vcmask 1039360   ;;  %vm1766_vm9 = vcmask 908288  }
  0x10   :  { %2163 = vmatmul.mubr.msk.f32.gmra.mrb[4].mxu0 %vm87_vm0, %v33_v17  ;;  %79 = vperm.xlu0 %2211, %v45_v18   ;;  %vm1669_vm11 = vcmask 916480   ;;  %vm2053_vm12 = vcmask 523264  }
  0x11   :  { %194 = vmatprep.mubr.f32.mxu0 %v4823_v7 }
  0x12   :  { %2219 = vrot.lane.b32.xlu1 %v4823_v7, %s2531_s10 }
  0x14   :  { %2164 = vmatmul.mubr.msk.f32.gmra.mrb[6].mxu0 %vm87_vm0, %v34_v19  ;;  %2214 = vrot.lane.b32.xlu0 %v4823_v7, %s2531_s10 }
  0x15   :  { %200 = vmatprep.mubr.f32.mxu0 %v4823_v7  ;;  %2233 = vset.pattern.permute.xlu0 %v2532_v21 }
  0x16   :  { %2229 = vrot.lane.b32.xlu1 %v4823_v7, %s2531_s10 }
  0x18   :  { %2165 = vmatmul.mubr.msk.f32.gmra.mrb[8].mxu0 %vm87_vm0, %v35_v20  ;;  %2224 = vrot.lane.b32.xlu0 %v4823_v7, %s2531_s10 }
  0x19   :  { %206 = vmatprep.mubr.f32.mxu0 %v4823_v7 }
  0x1a   :  { %544 = vperm.xlu1 %2212, %v2662_v22  }
  0x1c   :  { %2166 = vmatmul.mubr.msk.f32.gmra.mrb[10].mxu0 %vm87_vm0, %v36_v23  ;;  %610 = vperm.xlu0 %2233, %v2673_v24  }
  0x1d   :  { %212 = vmatprep.mubr.f32.mxu0 %v4823_v7 }
  0x1e   :  { %554 = vperm.xlu1 %2212, %v2680_v25  }
  0x20   :  { %2167 = vmatmul.mubr.msk.f32.gmra.mrb[12].mxu0 %vm87_vm0, %v37_v26  ;;  %622 = vperm.xlu0 %2233, %v2680_v25  }
  0x21   :  { %218 = vmatprep.mubr.f32.mxu0 %v4823_v7 }
  0x22   :  { %564 = vperm.xlu1 %2212, %v2692_v27  }
  0x24   :  { %2168 = vmatmul.mubr.msk.f32.gmra.mrb[14].mxu0 %vm87_vm0, %v38_v28  ;;  %630 = vperm.xlu0 %2233, %v2692_v27  }
  0x26   :  { %574 = vperm.xlu1 %2212, %v2704_v29  }
  0x28   :  { %638 = vperm.xlu0 %2233, %v2704_v29  }
  0x2a   :  { %2234 = vset.pattern.permute.xlu1 %v2532_v21 }
  0x2b   :  { %614 = vperm.xlu1 %2234, %v2662_v22  }
  0x2c   :  { %2241 = vrot.lane.b32.xlu0 %v4823_v7, %s2533_s29 }
  0x2d   :  { %2256 = vset.pattern.permute.xlu0 %v2534_v31 }
  0x2f   :  { %618 = vperm.xlu1 %2234, %v2713_v30  }
  0x30   :  { %2251 = vrot.lane.b32.xlu0 %v4823_v7, %s2533_s29 }
  0x33   :  { %626 = vperm.xlu1 %2234, %v2721_v32  }
  0x34   :  { %887 = vperm.xlu0 %2256, %v2662_v22  }
  0x37   :  { %634 = vperm.xlu1 %2234, %v2729_v33  }
  0x38   :  { %899 = vperm.xlu0 %2256, %v2721_v32  }
  0x3b   :  { %2236 = vrot.lane.b32.xlu1 %v4823_v7, %s2533_s29 }
  0x3c   :  { %2255 = vset.pattern.permute.xlu1 %v2534_v31  ;;  %907 = vperm.xlu0 %2256, %v2729_v33  }
  0x3f   :  { %2246 = vrot.lane.b32.xlu1 %v4823_v7, %s2533_s29 }
  0x40   :  { %2258 = vrot.lane.b32.xlu0 %v4823_v7, %s2535_s2 }
  0x41   :  { %2279 = vset.pattern.permute.xlu0 %v2536_v34 }
  0x43   :  { %883 = vperm.xlu1 %2255, %v2673_v24  }
  0x44   :  { %2268 = vrot.lane.b32.xlu0 %v4823_v7, %s2535_s2 }
  0x47   :  { %891 = vperm.xlu1 %2255, %v2713_v30  }
  0x48   :  { %1546 = vperm.xlu0 %2279, %v2662_v22  }
  0x4b   :  { %895 = vperm.xlu1 %2255, %v2680_v25  }
  0x4c   :  { %1558 = vperm.xlu0 %2279, %v2721_v32  }
  0x4f   :  { %903 = vperm.xlu1 %2255, %v2692_v27  }
  0x50   :  { %1566 = vperm.xlu0 %2279, %v2729_v33  }
  0x53   :  { %911 = vperm.xlu1 %2255, %v2704_v29  }
  0x54   :  { %2280 = vset.pattern.permute.xlu0 %v2537_v35 }
  0x55   :  { %1044 = vperm.xlu0 %2280, %v2673_v24  }
  0x57   :  { %2263 = vrot.lane.b32.xlu1 %v4823_v7, %s2535_s2 }
  0x58   :  { %2277 = vset.pattern.permute.xlu1 %v2537_v35 }
  0x59   :  { %1056 = vperm.xlu0 %2280, %v2680_v25  }
  0x5b   :  { %2273 = vrot.lane.b32.xlu1 %v4823_v7, %s2535_s2 }
  0x5d   :  { %1064 = vperm.xlu0 %2280, %v2692_v27  }
  0x5f   :  { %1048 = vperm.xlu1 %2277, %v2662_v22  }
  0x63   :  { %1052 = vperm.xlu1 %2277, %v2713_v30  }
  0x67   :  { %1060 = vperm.xlu1 %2277, %v2721_v32  }
  0x6b   :  { %2278 = vset.pattern.permute.xlu1 %v2536_v34 }
  0x6c   :  { %1542 = vperm.xlu1 %2278, %v2673_v24  }
  0x70   :  { %1550 = vperm.xlu1 %2278, %v2713_v30  }
  0x74   :  { %1554 = vperm.xlu1 %2278, %v2680_v25  }
  0x78   :  { %1562 = vperm.xlu1 %2278, %v2692_v27  }
  0x81   :  { %v2765_v36 = vpop.permute.xlu1 %59 }
  0x83   :  { %v50_v37 = vpop.permute.xlu0 %49 }
  0x85   :  { %v2767_v38 = vpop.permute.xlu1 %64 }
  0x87   :  { %v2769_v39 = vpop.permute.xlu0 %54 }
  0x89   :  { %v2771_v40 = vpop.permute.xlu1 %74 }
  0x8b   :  { %v2773_v41 = vpop.permute.xlu0 %69 }
  0x8d   :  { %v2775_v42 = vpop.permute.xlu1 %84 }
  0x8f   :  { %v2777_v43 = vpop.permute.xlu0 %79 }
  0x91   :  { %v2779_v44 = vpop.permute.xlu1 %2219 }
  0x93   :  { %v2781_v45 = vpop.permute.xlu0 %2214 }
  0x95   :  { %v2783_v46 = vpop.permute.xlu1 %2229 }
  0x96   :  { %4940 = vst [vmem:[#allocation6_spill] sm:$0xff] %v2783_v46 }
  0x97   :  { %v2785_v47 = vpop.permute.xlu0 %2224 }
  0x99   :  { %v2787_v48 = vpop.permute.xlu1 %544 }
  0x9b   :  { %v2789_v49 = vpop.permute.xlu0 %610 }
  0x9c   :  { %v641_v50 = vmul.f32 0.0, %v2789_v49 }
  0x9d   :  { %v2792_v51 = vpop.permute.xlu1 %554 }
  0x9e   :  { %4941 = vst [vmem:[#allocation7_spill] sm:$0xff] %v2792_v51  ;;  %689 = vrot.lane.b32.xlu1 %v641_v50, %s2538_s12 }
  0x9f   :  { %v2799_v54 = vpop.permute.xlu0 %622 }
  0xa0   :  { %v650_v57 = vmul.f32 0.0, %v2799_v54 }
  0xa1   :  { %v2795_v52 = vpop.permute.xlu1 %564 }
  0xa2   :  { %4942 = vst [vmem:[#allocation8_spill] sm:$0xff] %v2795_v52 }
  0xa3   :  { %v2808_v59 = vpop.permute.xlu0 %630 }
  0xa4   :  { %v656_v61 = vmul.f32 0.0, %v2808_v59 }
  0xa5   :  { %v2797_v53 = vpop.permute.xlu1 %574 }
  0xa6   :  { %4943 = vst [vmem:[#allocation9_spill] sm:$0xff] %v2797_v53 }
  0xa7   :  { %v2821_v1 = vpop.permute.xlu0 %638 }
  0xa8   :  { %v662_v4 = vmul.f32 0.0, %v2821_v1 }
  0xaa   :  { %v2801_v55 = vpop.permute.xlu1 %614 }
  0xab   :  { %v644_v56 = vmul.f32 0.0, %v2801_v55 }
  0xad   :  { %695 = vrot.lane.b32.xlu0 %v644_v56, %s2538_s12 }
  0xae   :  { %v2806_v58 = vpop.permute.xlu1 %618 }
  0xaf   :  { %v647_v60 = vmul.f32 0.0, %v2806_v58 }
  0xb1   :  { %701 = vrot.lane.b32.xlu1 %v647_v60, %s2538_s12  ;;  %707 = vrot.lane.b32.xlu0 %v650_v57, %s2538_s12 }
  0xb2   :  { %v2814_v62 = vpop.permute.xlu1 %626 }
  0xb3   :  { %v653_v63 = vmul.f32 0.0, %v2814_v62 }
  0xb5   :  { %713 = vrot.lane.b32.xlu1 %v653_v63, %s2538_s12  ;;  %719 = vrot.lane.b32.xlu0 %v656_v61, %s2538_s12 }
  0xb6   :  { %v2819_v0 = vpop.permute.xlu1 %634 }
  0xb7   :  { %v659_v2 = vmul.f32 0.0, %v2819_v0 }
  0xb9   :  { %725 = vrot.lane.b32.xlu1 %v659_v2, %s2538_s12  ;;  %1068 = vperm.xlu0 %2280, %v2729_v33  }
  0xba   :  { %v2839_v18 = vpop.permute.xlu1 %2236 }
  0xbd   :  { %1570 = vperm.xlu1 %2278, %v2704_v29   ;;  %731 = vrot.lane.b32.xlu0 %v662_v4, %s2538_s12 }
  0xbe   :  { %2283 = vset.pattern.permute.xlu0 %v4821_v5  ;;  %v2845_v28 = vpop.permute.xlu1 %2246 }
  0xbf   :  { %4944 = vst [vmem:[#allocation10_spill] sm:$0xff] %v2845_v28 }
  0xc1   :  { %2281 = vset.pattern.permute.xlu1 %v2537_v35  ;;  %1112 = vperm.xlu0 %2283, %v2662_v22  }
  0xc2   :  { %1072 = vperm.xlu1 %2281, %v2704_v29   ;;  %v2852_v63 = vpop.permute.xlu1 %883 }
  0xc3   :  { %4945 = vst [vmem:[#allocation11_spill] sm:$0xff] %v2852_v63 }
  0xc6   :  { %2282 = vset.pattern.permute.xlu1 %v4821_v5 }
  0xc7   :  { %1108 = vperm.xlu1 %2282, %v2673_v24  }
  0xcb   :  { %1116 = vperm.xlu1 %2282, %v2713_v30  }
  0xcf   :  { %1120 = vperm.xlu1 %2282, %v2680_v25  }
  0xdb   :  { %v178_v6 = vpop.f32.mrb[0].mxu0 }
  0xdc   :  { %v179_v8 = vadd.f32 %v178_v6, %v50_v37  ;;  %v180_v9 = vpop.f32.mrb[1].mxu0 }
  0xdd   :  { %v181_v10 = vadd.f32 %v180_v9, %v50_v37 }
  0xde   :  { %v225_v11 = vsub.f32 0.0, %v179_v8 }
  0xdf   :  { %v226_v12 = vsub.f32 0.0, %v181_v10  ;;  %v184_v13 = vpop.f32.mrb[2].mxu0 }
  0xe0   :  { %v241_v14 = vmul.f32 1.442695, %v225_v11  ;;  %v2837_v15 = vadd.f32 %v184_v13, %v2769_v39  ;;  %v186_v16 = vpop.f32.mrb[3].mxu0  ;;  %v2863_v11 = vpop.permute.xlu1 %891 }
  0xe1   :  { %v243_v17 = vmul.f32 1.442695, %v226_v12  ;;  %v2843_v21 = vadd.f32 %v186_v16, %v2769_v39  ;;  %4946 = vst [vmem:[#allocation12_spill] sm:$0xff] %v2863_v11 }
  0xe2   :  { %2365 = vpow2.f32 %v241_v14  ;;  %v227_v20 = vsub.f32 0.0, %v2837_v15 }
  0xe3   :  { %2367 = vpow2.f32 %v243_v17  ;;  %v190_v19 = vpop.f32.mrb[4].mxu0  ;;  %v228_v34 = vsub.f32 0.0, %v2843_v21 }
  0xe4   :  { %v192_v23 = vpop.f32.mrb[5].mxu0  ;;  %v245_v31 = vmul.f32 1.442695, %v227_v20  ;;  %v2857_v4 = vadd.f32 %v190_v19, %v2765_v36 }
  0xe5   :  { %v247_v56 = vmul.f32 1.442695, %v228_v34  ;;  %v2867_v13 = vadd.f32 %v192_v23, %v2765_v36 }
  0xe6   :  { %2369 = vpow2.f32 %v245_v31  ;;  %v229_v12 = vsub.f32 0.0, %v2857_v4 }
  0xe7   :  { %v196_v26 = vpop.f32.mrb[6].mxu0  ;;  %v230_v19 = vsub.f32 0.0, %v2867_v13 }
  0xe8   :  { %v198_v35 = vpop.f32.mrb[7].mxu0  ;;  %v249_v20 = vmul.f32 1.442695, %v229_v12 }
  0xe9   :  { %v251_v36 = vmul.f32 1.442695, %v230_v19  ;;  %v2900_v19 = vadd.f32 %v198_v35, %v2767_v38 }
  0xeb   :  { %v2848_v37 = vpop.f32.mrb[8].mxu0 }
  0xec   :  { %v2366_v50 = vpop.eup %2365  ;;  %v2850_v57 = vpop.f32.mrb[9].mxu0 }
  0xed   :  { %v2368_v60 = vpop.eup %2367  ;;  %v273_v61 = vadd.f32 1.0, %v2366_v50 }
  0xee   :  { %v274_v39 = vadd.f32 1.0, %v2368_v60  ;;  %v2876_v60 = vpop.permute.xlu1 %895 }
  0xef   :  { %2371 = vrcp.f32 %v273_v61  ;;  %v2854_v2 = vpop.f32.mrb[10].mxu0 }
  0xf0   :  { %2373 = vpow2.f32 %v247_v56  ;;  %v2859_v6 = vpop.f32.mrb[11].mxu0  ;;  %v2370_v16 = vpop.eup %2369 }
  0xf1   :  { %2375 = vrcp.f32 %v274_v39  ;;  %v275_v50 = vadd.f32 1.0, %v2370_v16  ;;  %v2889_v16 = vadd.f32 %v196_v26, %v2767_v38  ;;  %v232_v38 = vsub.f32 0.0, %v2900_v19 }
  0xf2   :  { %2377 = vpow2.f32 %v249_v20  ;;  %v2886_v3 = vpop.permute.xlu1 %903  ;;  %v2896_v20 = vpop.permute.xlu0 %2241 }
  0xf3   :  { %v2861_v9 = vpop.f32.mrb[12].mxu0  ;;  %2379 = vrcp.f32 %v275_v50  ;;  %4949 = vst [vmem:[#allocation15_spill] sm:$0xff] %v2886_v3  ;;  %4950 = vst [vmem:[#allocation16_spill] sm:$0xff] %v2896_v20 }
  0xf4   :  { %v2869_v14 = vpop.f32.mrb[13].mxu0  ;;  %2381 = vpow2.f32 %v251_v36 }
  0xf6   :  { %v2918_v7 = vpop.permute.xlu0 %2251 }
  0xf7   :  { %v2871_v17 = vpop.f32.mrb[14].mxu0  ;;  %4953 = vst [vmem:[#allocation19_spill] sm:$0xff] %v2918_v7 }
  0xf8   :  { %v2874_v31 = vpop.f32.mrb[15].mxu0 }
  0xf9   :  { %v2372_v34 = vpop.eup %2371 }
  0xfa   :  { %v2374_v56 = vpop.eup %2373  ;;  %v2878_v61 = vmul.f32 %v2372_v34, %v179_v8  ;;  %v4825_v8 = vmov 5   ;;  %v2906_v34 = vpop.permute.xlu1 %911 }
  0xfb   :  { %v2376_v39 = vpop.eup %2375  ;;  %v276_v23 = vadd.f32 1.0, %v2374_v56  ;;  %2284 = vset.pattern.permute.xlu1 %v4825_v8  ;;  %4951 = vst [vmem:[#allocation17_spill] sm:$0xff] %v2906_v34 }
  0xfc   :  { %4947 = vst [vmem:[#allocation13_spill] sm:$0xff] %v2878_v61  ;;  %787 = vrot.lane.b32.xlu0 %v2878_v61, %s2533_s29  ;;  %434 = vrot.lane.b32.xlu1 %v2878_v61, %s2531_s10  ;;  %v2884_v12 = vmul.f32 %v2376_v39, %v181_v10  ;;  %v231_v10 = vsub.f32 0.0, %v2889_v16  ;;  %v2378_v26 = vpop.eup %2377  ;;  %v642_v56 = vmul.f32 %v2789_v49, %v2878_v61 }
  0xfd   :  { %2383 = vrcp.f32 %v276_v23  ;;  %v2380_v39 = vpop.eup %2379  ;;  %v277_v35 = vadd.f32 1.0, %v2378_v26 }
  0xfe   :  { %4948 = vst [vmem:[#allocation14_spill] sm:$0xff] %v2884_v12  ;;  %v643_v50 = vmul.f32 %v2789_v49, %v2884_v12  ;;  %v253_v36 = vmul.f32 1.442695, %v231_v10  ;;  %v2382_v23 = vpop.eup %2381  ;;  %v2916_v5 = vmul.f32 %v2380_v39, %v2837_v15  ;;  %v2920_v53 = vpop.permute.xlu1 %2263  ;;  %v255_v49 = vmul.f32 1.442695, %v232_v38 }
  0xff   :  { %v278_v10 = vadd.f32 1.0, %v2382_v23  ;;  %v2929_v15 = vpop.permute.xlu0 %887 }
 0x100   :  { %436 = vrot.lane.b32.xlu0 %v2884_v12, %s2531_s10  ;;  %948 = vrot.lane.b32.xlu1 %v2878_v61, %s2535_s2  ;;  %4952 = vst [vmem:[#allocation18_spill] sm:$0xff] %v2916_v5  ;;  %2385 = vpow2.f32 %v253_v36  ;;  %v645_v36 = vmul.f32 %v2801_v55, %v2916_v5 }
 0x101   :  { %2387 = vrcp.f32 %v277_v35 }
 0x102   :  { %2389 = vpow2.f32 %v255_v49 }
 0x103   :  { %2391 = vrcp.f32 %v278_v10 }
 0x104   :  { %950 = vrot.lane.b32.xlu0 %v2884_v12, %s2535_s2  ;;  %789 = vrot.lane.b32.xlu1 %v2884_v12, %s2533_s29 }
 0x107   :  { %v2384_v8 = vpop.eup %2383 }
 0x108   :  { %693 = vrot.lane.b32.xlu1 %v643_v50, %s2538_s12  ;;  %691 = vrot.lane.b32.xlu0 %v642_v56, %s2538_s12  ;;  %v2927_v26 = vmul.f32 %v2384_v8, %v2843_v21  ;;  %v2933_v50 = vadd.f32 %v2848_v37, %v2773_v41  ;;  %v2939_v56 = vpop.permute.xlu1 %2273  ;;  %v2944_v21 = vadd.f32 %v2850_v57, %v2773_v41  ;;  %v2950_v8 = vpop.permute.xlu0 %899 }
 0x109   :  { %4955 = vst [vmem:[#allocation21_spill] sm:$0xff] %v2939_v56  ;;  %4956 = vst [vmem:[#allocation22_spill] sm:$0xff] %v2950_v8 }
 0x10a   :  { %4954 = vst [vmem:[#allocation20_spill] sm:$0xff] %v2927_v26  ;;  %v233_v39 = vsub.f32 0.0, %v2933_v50  ;;  %v2386_v37 = vpop.eup %2385  ;;  %v646_v38 = vmul.f32 %v2801_v55, %v2927_v26  ;;  %v234_v41 = vsub.f32 0.0, %v2944_v21 }
 0x10b   :  { %v2388_v35 = vpop.eup %2387  ;;  %v279_v49 = vadd.f32 1.0, %v2386_v37 }
 0x10c   :  { %440 = vrot.lane.b32.xlu1 %v2916_v5, %s2531_s10  ;;  %793 = vrot.lane.b32.xlu0 %v2916_v5, %s2533_s29  ;;  %v257_v23 = vmul.f32 1.442695, %v233_v39  ;;  %v2957_v57 = vpop.permute.xlu1 %1048  ;;  %v2390_v10 = vpop.eup %2389  ;;  %v2962_v34 = vmul.f32 %v2388_v35, %v2857_v4  ;;  %v259_v46 = vmul.f32 1.442695, %v234_v41  ;;  %v2977_v4 = vadd.f32 %v2854_v2, %v2771_v40 }
 0x10d   :  { %v2392_v56 = vpop.eup %2391  ;;  %v2964_v7 = vpop.permute.xlu0 %907  ;;  %v280_v55 = vadd.f32 1.0, %v2390_v10 }
 0x10e   :  { %2393 = vpow2.f32 %v257_v23  ;;  %4957 = vst [vmem:[#allocation23_spill] sm:$0xff] %v2964_v7  ;;  %v2971_v39 = vmul.f32 %v2392_v56, %v2867_v13  ;;  %v2988_v13 = vadd.f32 %v2859_v6, %v2771_v40  ;;  %v648_v35 = vmul.f32 %v2806_v58, %v2962_v34 }
 0x10f   :  { %2395 = vrcp.f32 %v279_v49 }
 0x110   :  { %954 = vrot.lane.b32.xlu1 %v2916_v5, %s2535_s2  ;;  %442 = vrot.lane.b32.xlu0 %v2927_v26, %s2531_s10  ;;  %4958 = vst [vmem:[#allocation24_spill] sm:$0xff] %v2971_v39  ;;  %v2973_v37 = vpop.permute.xlu1 %1052  ;;  %2397 = vpow2.f32 %v259_v46  ;;  %v649_v56 = vmul.f32 %v2806_v58, %v2971_v39  ;;  %v236_v40 = vsub.f32 0.0, %v2988_v13 }
 0x111   :  { %4959 = vst [vmem:[#allocation25_spill] sm:$0xff] %v2973_v37  ;;  %2399 = vrcp.f32 %v280_v55 }
 0x112   :  { %v263_v58 = vmul.f32 1.442695, %v236_v40 }
 0x114   :  { %795 = vrot.lane.b32.xlu1 %v2927_v26, %s2533_s29  ;;  %956 = vrot.lane.b32.xlu0 %v2927_v26, %s2535_s2  ;;  %v2990_v46 = vpop.permute.xlu1 %1060 }
 0x115   :  { %4961 = vst [vmem:[#allocation27_spill] sm:$0xff] %v2990_v46 }
 0x118   :  { %697 = vrot.lane.b32.xlu1 %v645_v36, %s2538_s12  ;;  %699 = vrot.lane.b32.xlu0 %v646_v38, %s2538_s12  ;;  %v2983_v36 = vpop.permute.xlu0 %2258  ;;  %v235_v38 = vsub.f32 0.0, %v2977_v4  ;;  %v2394_v2 = vpop.eup %2393 }
 0x119   :  { %4960 = vst [vmem:[#allocation26_spill] sm:$0xff] %v2983_v36  ;;  %v2396_v23 = vpop.eup %2395  ;;  %v281_v49 = vadd.f32 1.0, %v2394_v2  ;;  %v3008_v7 = vpop.permute.xlu1 %1542 }
 0x11a   :  { %v261_v41 = vmul.f32 1.442695, %v235_v38  ;;  %v2398_v10 = vpop.eup %2397  ;;  %v3006_v55 = vmul.f32 %v2396_v23, %v2889_v16 }
 0x11b   :  { %v2400_v3 = vpop.eup %2399  ;;  %v282_v38 = vadd.f32 1.0, %v2398_v10 }
 0x11c   :  { %799 = vrot.lane.b32.xlu1 %v2962_v34, %s2533_s29  ;;  %446 = vrot.lane.b32.xlu0 %v2962_v34, %s2531_s10  ;;  %v3001_v6 = vpop.permute.xlu0 %2268  ;;  %2401 = vpow2.f32 %v261_v41 }
 0x11d   :  { %4962 = vst [vmem:[#allocation28_spill] sm:$0xff] %v3001_v6  ;;  %2403 = vrcp.f32 %v281_v49  ;;  %v3019_v16 = vpop.permute.xlu1 %1550  ;;  %v651_v49 = vmul.f32 %v2799_v54, %v3006_v55 }
 0x11e   :  { %2405 = vpow2.f32 %v263_v58 }
 0x11f   :  { %2407 = vrcp.f32 %v282_v38 }
 0x120   :  { %448 = vrot.lane.b32.xlu1 %v2971_v39, %s2531_s10  ;;  %960 = vrot.lane.b32.xlu0 %v2962_v34, %s2535_s2  ;;  %v3017_v2 = vpop.permute.xlu0 %1546 }
 0x121   :  { %v3036_v41 = vpop.permute.xlu1 %1554 }
 0x124   :  { %962 = vrot.lane.b32.xlu1 %v2971_v39, %s2535_s2  ;;  %801 = vrot.lane.b32.xlu0 %v2971_v39, %s2533_s29  ;;  %v3029_v23 = vpop.permute.xlu0 %1558 }
 0x125   :  { %v3049_v38 = vpop.permute.xlu1 %1562 }
 0x128   :  { %705 = vrot.lane.b32.xlu1 %v649_v56, %s2538_s12  ;;  %703 = vrot.lane.b32.xlu0 %v648_v35, %s2538_s12  ;;  %v3015_v56 = vmul.f32 %v2400_v3, %v2900_v19  ;;  %v3023_v35 = vadd.f32 %v2861_v9, %v2777_v43  ;;  %v3034_v19 = vadd.f32 %v2869_v14, %v2777_v43  ;;  %v2402_v9 = vpop.eup %2401  ;;  %v3042_v40 = vpop.permute.xlu0 %1566 }
 0x129   :  { %v2404_v58 = vpop.eup %2403  ;;  %v283_v46 = vadd.f32 1.0, %v2402_v9  ;;  %v3058_v63 = vpop.permute.xlu1 %689 }
 0x12a   :  { %4963 = vst [vmem:[#allocation29_spill] sm:$0xff] %v3015_v56  ;;  %v237_v3 = vsub.f32 0.0, %v3023_v35  ;;  %v652_v10 = vmul.f32 %v2799_v54, %v3015_v56  ;;  %v238_v14 = vsub.f32 0.0, %v3034_v19  ;;  %v2406_v8 = vpop.eup %2405  ;;  %v3054_v52 = vmul.f32 %v2404_v58, %v2933_v50  ;;  %4966 = vst [vmem:[#allocation32_spill] sm:$0xff] %v3058_v63 }
 0x12b   :  { %v2408_v11 = vpop.eup %2407  ;;  %v3069_v50 = vadd.f32 %v2871_v17, %v2775_v42 }
 0x12c   :  { %805 = vrot.lane.b32.xlu1 %v3006_v55, %s2533_s29  ;;  %452 = vrot.lane.b32.xlu0 %v3006_v55, %s2531_s10  ;;  %v265_v43 = vmul.f32 1.442695, %v237_v3  ;;  %4964 = vst [vmem:[#allocation30_spill] sm:$0xff] %v3054_v52  ;;  %v3056_v37 = vpop.permute.xlu0 %1044  ;;  %v267_v54 = vmul.f32 1.442695, %v238_v14  ;;  %v284_v3 = vadd.f32 1.0, %v2406_v8  ;;  %v3065_v9 = vmul.f32 %v2408_v11, %v2944_v21 }
 0x12d   :  { %4965 = vst [vmem:[#allocation31_spill] sm:$0xff] %v3056_v37  ;;  %v239_v8 = vsub.f32 0.0, %v3069_v50  ;;  %v3082_v11 = vadd.f32 %v2874_v31, %v2775_v42  ;;  %v654_v58 = vmul.f32 %v2814_v62, %v3054_v52 }
 0x12e   :  { %2409 = vpow2.f32 %v265_v43  ;;  %4967 = vst [vmem:[#allocation33_spill] sm:$0xff] %v3065_v9 }
 0x12f   :  { %2411 = vrcp.f32 %v283_v46  ;;  %v655_v46 = vmul.f32 %v2814_v62, %v3065_v9  ;;  %v269_v14 = vmul.f32 1.442695, %v239_v8  ;;  %v240_v42 = vsub.f32 0.0, %v3082_v11 }
 0x130   :  { %454 = vrot.lane.b32.xlu1 %v3015_v56, %s2531_s10  ;;  %966 = vrot.lane.b32.xlu0 %v3006_v55, %s2535_s2  ;;  %2413 = vpow2.f32 %v267_v54 }
 0x131   :  { %2415 = vrcp.f32 %v284_v3  ;;  %v271_v63 = vmul.f32 1.442695, %v240_v42 }
 0x132   :  { %2417 = vpow2.f32 %v269_v14 }
 0x134   :  { %968 = vrot.lane.b32.xlu1 %v3015_v56, %s2535_s2  ;;  %807 = vrot.lane.b32.xlu0 %v3015_v56, %s2533_s29 }
 0x138   :  { %709 = vrot.lane.b32.xlu1 %v651_v49, %s2538_s12  ;;  %711 = vrot.lane.b32.xlu0 %v652_v10, %s2538_s12  ;;  %v3071_v49 = vpop.permute.xlu0 %1056  ;;  %v3077_v10 = vpop.permute.xlu1 %701 }
 0x139   :  { %4968 = vst [vmem:[#allocation34_spill] sm:$0xff] %v3077_v10  ;;  %v2410_v17 = vpop.eup %2409 }
 0x13a   :  { %v2412_v43 = vpop.eup %2411  ;;  %v285_v54 = vadd.f32 1.0, %v2410_v17 }
 0x13b   :  { %v2414_v3 = vpop.eup %2413 }
 0x13c   :  { %458 = vrot.lane.b32.xlu1 %v3054_v52, %s2531_s10  ;;  %811 = vrot.lane.b32.xlu0 %v3054_v52, %s2533_s29  ;;  %v3088_v21 = vpop.permute.xlu0 %1064  ;;  %v3095_v31 = vpop.permute.xlu1 %713  ;;  %2419 = vrcp.f32 %v285_v54  ;;  %v286_v62 = vadd.f32 1.0, %v2414_v3 }
 0x13d   :  { %4969 = vst [vmem:[#allocation35_spill] sm:$0xff] %v3088_v21  ;;  %4970 = vst [vmem:[#allocation36_spill] sm:$0xff] %v3095_v31  ;;  %v3100_v21 = vmul.f32 %v2412_v43, %v2977_v4  ;;  %v2416_v10 = vpop.eup %2415  ;;  %2421 = vpow2.f32 %v271_v63 }
 0x13e   :  { %v3109_v8 = vmul.f32 %v2416_v10, %v2988_v13  ;;  %2423 = vrcp.f32 %v286_v62  ;;  %v2418_v13 = vpop.eup %2417 }
 0x13f   :  { %4971 = vst [vmem:[#allocation37_spill] sm:$0xff] %v3100_v21  ;;  %v657_v63 = vmul.f32 %v2808_v59, %v3100_v21  ;;  %v287_v42 = vadd.f32 1.0, %v2418_v13 }
 0x140   :  { %972 = vrot.lane.b32.xlu1 %v3054_v52, %s2535_s2  ;;  %460 = vrot.lane.b32.xlu0 %v3065_v9, %s2531_s10  ;;  %v3102_v37 = vpop.permute.xlu0 %695  ;;  %4973 = vst [vmem:[#allocation39_spill] sm:$0xff] %v3109_v8  ;;  %v3111_v17 = vpop.permute.xlu1 %725  ;;  %v658_v10 = vmul.f32 %v2808_v59, %v3109_v8 }
 0x141   :  { %4972 = vst [vmem:[#allocation38_spill] sm:$0xff] %v3102_v37  ;;  %4974 = vst [vmem:[#allocation40_spill] sm:$0xff] %v3111_v17  ;;  %2425 = vrcp.f32 %v287_v42 }
 0x144   :  { %813 = vrot.lane.b32.xlu1 %v3065_v9, %s2533_s29  ;;  %974 = vrot.lane.b32.xlu0 %v3065_v9, %s2535_s2  ;;  %v3117_v4 = vpop.permute.xlu0 %707 }
 0x148   :  { %717 = vrot.lane.b32.xlu1 %v655_v46, %s2538_s12  ;;  %715 = vrot.lane.b32.xlu0 %v654_v58, %s2538_s12  ;;  %v3119_v46 = vpop.permute.xlu1 %1570  ;;  %v2420_v58 = vpop.eup %2419 }
 0x149   :  { %v3129_v43 = vpop.permute.xlu0 %719  ;;  %v2422_v54 = vpop.eup %2421  ;;  %v3136_v3 = vmul.f32 %v2420_v58, %v3023_v35 }
 0x14a   :  { %4975 = vst [vmem:[#allocation41_spill] sm:$0xff] %v3129_v43  ;;  %v2424_v62 = vpop.eup %2423  ;;  %v288_v59 = vadd.f32 1.0, %v2422_v54 }
 0x14b   :  { %4977 = vst [vmem:[#allocation43_spill] sm:$0xff] %v3136_v3  ;;  %v3143_v17 = vmul.f32 %v2424_v62, %v3034_v19  ;;  %v660_v58 = vmul.f32 %v2819_v0, %v3136_v3  ;;  %v2426_v42 = vpop.eup %2425 }
 0x14c   :  { %464 = vrot.lane.b32.xlu1 %v3100_v21, %s2531_s10  ;;  %817 = vrot.lane.b32.xlu0 %v3100_v21, %s2533_s29  ;;  %v3131_v14 = vpop.permute.xlu1 %1072  ;;  %2427 = vrcp.f32 %v288_v59  ;;  %v3168_v54 = vmul.f32 %v2426_v42, %v3069_v50 }
 0x14d   :  { %4976 = vst [vmem:[#allocation42_spill] sm:$0xff] %v3131_v14  ;;  %4978 = vst [vmem:[#allocation44_spill] sm:$0xff] %v3143_v17  ;;  %v661_v19 = vmul.f32 %v2819_v0, %v3143_v17 }
 0x14e   :  { %4983 = vst [vmem:[#allocation49_spill] sm:$0xff] %v3168_v54 }
 0x150   :  { %978 = vrot.lane.b32.xlu1 %v3100_v21, %s2535_s2  ;;  %466 = vrot.lane.b32.xlu0 %v3109_v8, %s2531_s10 }
 0x154   :  { %819 = vrot.lane.b32.xlu1 %v3109_v8, %s2533_s29  ;;  %980 = vrot.lane.b32.xlu0 %v3109_v8, %s2535_s2 }
 0x156   :  { %v2428_v14 = vpop.eup %2427 }
 0x157   :  { %v3179_v0 = vmul.f32 %v2428_v14, %v3082_v11 }
 0x158   :  { %721 = vrot.lane.b32.xlu1 %v657_v63, %s2538_s12  ;;  %723 = vrot.lane.b32.xlu0 %v658_v10, %s2538_s12  ;;  %v3145_v63 = vpop.permute.xlu0 %1068  ;;  %v3147_v10 = vpop.permute.xlu1 %1108 }
 0x159   :  { %4979 = vst [vmem:[#allocation45_spill] sm:$0xff] %v3145_v63  ;;  %4980 = vst [vmem:[#allocation46_spill] sm:$0xff] %v3147_v10  ;;  %v4998_v10 = vmov 4  }
 0x15a   :  { %4985 = vst [vmem:[#allocation51_spill] sm:$0xff] %v3179_v0 }
 0x15c   :  { %823 = vrot.lane.b32.xlu1 %v3136_v3, %s2533_s29  ;;  %470 = vrot.lane.b32.xlu0 %v3136_v3, %s2531_s10  ;;  %v3153_v35 = vpop.permute.xlu0 %731  ;;  %v3155_v13 = vpop.permute.xlu1 %1116 }
 0x15d   :  { %4981 = vst [vmem:[#allocation47_spill] sm:$0xff] %v3153_v35  ;;  %4982 = vst [vmem:[#allocation48_spill] sm:$0xff] %v3155_v13  ;;  %v663_v35 = vmul.f32 %v2821_v1, %v3168_v54 }
 0x160   :  { %472 = vrot.lane.b32.xlu1 %v3143_v17, %s2531_s10  ;;  %984 = vrot.lane.b32.xlu0 %v3136_v3, %s2535_s2  ;;  %v3170_v62 = vpop.permute.xlu0 %1112  ;;  %v3172_v59 = vpop.permute.xlu1 %1120 }
 0x161   :  { %4984 = vst [vmem:[#allocation50_spill] sm:$0xff] %v3170_v62 }
 0x164   :  { %986 = vrot.lane.b32.xlu1 %v3143_v17, %s2535_s2  ;;  %825 = vrot.lane.b32.xlu0 %v3143_v17, %s2533_s29 }
 0x168   :  { %729 = vrot.lane.b32.xlu1 %v661_v19, %s2538_s12  ;;  %727 = vrot.lane.b32.xlu0 %v660_v58, %s2538_s12 }
 0x16c   :  { %829 = vrot.lane.b32.xlu1 %v3168_v54, %s2533_s29  ;;  %476 = vrot.lane.b32.xlu0 %v3168_v54, %s2531_s10 }
 0x16e   :  { %v3181_v19 = vpop.permute.xlu0 %787  ;;  %v3183_v58 = vpop.permute.xlu1 %434 }
 0x16f   :  { %4986 = vst [vmem:[#allocation52_spill] sm:$0xff] %v3181_v19  ;;  %4987 = vst [vmem:[#allocation53_spill] sm:$0xff] %v3183_v58 }
 0x170   :  { %478 = vrot.lane.b32.xlu1 %v3179_v0, %s2531_s10  ;;  %990 = vrot.lane.b32.xlu0 %v3168_v54, %s2535_s2  ;;  %s2541_s10 = smov 127  }
 0x172   :  { %v3189_v50 = vpop.permute.xlu0 %436  ;;  %v3191_v42 = vpop.permute.xlu1 %948 }
 0x173   :  { %4988 = vst [vmem:[#allocation54_spill] sm:$0xff] %v3189_v50  ;;  %4989 = vst [vmem:[#allocation55_spill] sm:$0xff] %v3191_v42 }
 0x174   :  { %992 = vrot.lane.b32.xlu1 %v3179_v0, %s2535_s2  ;;  %831 = vrot.lane.b32.xlu0 %v3179_v0, %s2533_s29 }
 0x176   :  { %v3197_v11 = vpop.permute.xlu0 %950  ;;  %v3199_v14 = vpop.permute.xlu1 %789 }
 0x177   :  { %4990 = vst [vmem:[#allocation56_spill] sm:$0xff] %v3197_v11  ;;  %4991 = vst [vmem:[#allocation57_spill] sm:$0xff] %v3199_v14  ;;  %v4846_v14 = vmov 6   ;;  %v4994_v11 = vmov 5  }
 0x178   :  { %733 = vrot.lane.b32.xlu1 %v663_v35, %s2538_s12  ;;  %1221 = vrot.lane.b32.xlu0 %v2884_v12, %s2541_s10 }
 0x17a   :  { %v3206_v63 = vpop.permute.xlu1 %693  ;;  %v3208_v31 = vpop.permute.xlu0 %691 }
 0x17b   :  { %4992 = vst [vmem:[#allocation58_spill] sm:$0xff] %v3206_v63  ;;  %4993 = vst [vmem:[#allocation59_spill] sm:$0xff] %v3208_v31  ;;  %v664_v31 = vmul.f32 %v2821_v1, %v3179_v0  ;;  %v4995_v1 = vmov 0.0  }
 0x17c   :  { %1321 = vperm.xlu1 %2284, %v2662_v22   ;;  %1227 = vrot.lane.b32.xlu0 %v2927_v26, %s2541_s10 }
 0x17e   :  { %v3213_v43 = vpop.permute.xlu1 %440  ;;  %v3215_v50 = vpop.permute.xlu0 %793 }
 0x180   :  { %2285 = vset.pattern.permute.xlu1 %v4846_v14  ;;  %1128 = vperm.xlu0 %2283, %v2692_v27  }
 0x181   :  { %1478 = vperm.xlu1 %2285, %v2673_v24  }
 0x182   :  { %v3220_v35 = vpop.permute.xlu1 %954  ;;  %v3222_v63 = vpop.permute.xlu0 %442 }
 0x184   :  { %735 = vrot.lane.b32.xlu0 %v664_v31, %s2538_s12 }
 0x185   :  { %2286 = vset.pattern.permute.xlu1 %v4994_v11 }
 0x186   :  { %1325 = vperm.xlu1 %2286, %v2713_v30   ;;  %v3229_v42 = vpop.permute.xlu1 %795  ;;  %v3231_v14 = vpop.permute.xlu0 %956 }
 0x188   :  { %1388 = vrot.lane.b32.xlu0 %v2927_v26, %s2543_s13 }
 0x18a   :  { %1329 = vperm.xlu1 %2286, %v2680_v25   ;;  %v3236_v58 = vpop.permute.xlu1 %697  ;;  %v3238_v19 = vpop.permute.xlu0 %699 }
 0x18c   :  { %1233 = vrot.lane.b32.xlu0 %v2971_v39, %s2541_s10 }
 0x18e   :  { %2288 = vrot.lane.b32.xlu1 %v4995_v1, %s2541_s10  ;;  %v3244_v31 = vpop.permute.xlu1 %799  ;;  %v3246_v13 = vpop.permute.xlu0 %446 }
 0x18f   :  { %4996 = vst [vmem:[#allocation60_spill] sm:$0xff] %v3244_v31  ;;  %4997 = vst [vmem:[#allocation61_spill] sm:$0xff] %v3246_v13  ;;  %2292 = vset.pattern.permute.xlu1 %v4998_v10  ;;  %v5003_v13 = vmov 6  }
 0x190   :  { %1239 = vrot.lane.b32.xlu0 %v3015_v56, %s2541_s10 }
 0x192   :  { %1124 = vperm.xlu1 %2292, %v2721_v32   ;;  %v3252_v37 = vpop.permute.xlu1 %448  ;;  %v3254_v6 = vpop.permute.xlu0 %960 }
 0x193   :  { %4999 = vst [vmem:[#allocation62_spill] sm:$0xff] %v3252_v37  ;;  %5000 = vst [vmem:[#allocation63_spill] sm:$0xff] %v3254_v6 }
 0x194   :  { %1136 = vperm.xlu0 %2283, %v2704_v29  }
 0x196   :  { %1219 = vrot.lane.b32.xlu1 %v2878_v61, %s2541_s10  ;;  %v3259_v62 = vpop.permute.xlu1 %962  ;;  %v3261_v31 = vpop.permute.xlu0 %801 }
 0x197   :  { %5001 = vst [vmem:[#allocation64_spill] sm:$0xff] %v3259_v62  ;;  %5002 = vst [vmem:[#allocation65_spill] sm:$0xff] %v3261_v31  ;;  %2293 = vset.pattern.permute.xlu1 %v5003_v13  ;;  %v4859_v62 = vmov 8  }
 0x198   :  { %2307 = vset.pattern.permute.xlu0 %v4994_v11 }
 0x199   :  { %1317 = vperm.xlu0 %2307, %v2673_v24  }
 0x19a   :  { %1225 = vrot.lane.b32.xlu1 %v2916_v5, %s2541_s10  ;;  %v3268_v37 = vpop.permute.xlu1 %705  ;;  %v3270_v6 = vpop.permute.xlu0 %703 }
 0x19b   :  { %5004 = vst [vmem:[#allocation66_spill] sm:$0xff] %v3268_v37  ;;  %5005 = vst [vmem:[#allocation67_spill] sm:$0xff] %v3270_v6 }
 0x19d   :  { %1337 = vperm.xlu0 %2307, %v2692_v27  }
 0x19e   :  { %1490 = vperm.xlu1 %2293, %v2680_v25   ;;  %v3274_v29 = vpop.permute.xlu1 %805  ;;  %v3276_v31 = vpop.permute.xlu0 %452 }
 0x19f   :  { %5006 = vst [vmem:[#allocation68_spill] sm:$0xff] %v3276_v31 }
 0x1a1   :  { %1394 = vrot.lane.b32.xlu0 %v2971_v39, %s2543_s13 }
 0x1a2   :  { %2294 = vset.pattern.permute.xlu1 %v4859_v62  ;;  %v3281_v36 = vpop.permute.xlu1 %454  ;;  %v3283_v28 = vpop.permute.xlu0 %966 }
 0x1a3   :  { %5007 = vst [vmem:[#allocation69_spill] sm:$0xff] %v3281_v36  ;;  %1816 = vperm.xlu1 %2294, %v2673_v24   ;;  %v1882_v36 = vld [vmem:[%s4815_s4 + $0x18] sm:$0xff] }
 0x1a5   :  { %1400 = vrot.lane.b32.xlu0 %v3015_v56, %s2543_s13 }
 0x1a6   :  { %v3288_v25 = vpop.permute.xlu1 %968  ;;  %v3290_v27 = vpop.permute.xlu0 %807 }
 0x1a7   :  { %5008 = vst [vmem:[#allocation70_spill] sm:$0xff] %v3288_v25  ;;  %5009 = vst [vmem:[#allocation71_spill] sm:$0xff] %v3290_v27  ;;  %1382 = vrot.lane.b32.xlu1 %v2884_v12, %s2543_s13 }
 0x1a8   :  { %2300 = vset.pattern.permute.xlu1 %v4994_v11 }
 0x1a9   :  { %2317 = vrot.lane.b32.xlu0 %v4995_v1, %s2545_s14 }
 0x1aa   :  { %v3297_v62 = vpop.permute.xlu1 %709  ;;  %v3299_v37 = vpop.permute.xlu0 %711 }
 0x1ab   :  { %5010 = vst [vmem:[#allocation72_spill] sm:$0xff] %v3297_v62  ;;  %5011 = vst [vmem:[#allocation73_spill] sm:$0xff] %v3299_v37  ;;  %2296 = vrot.lane.b32.xlu1 %v4995_v1, %s2543_s13 }
 0x1ad   :  { %1341 = vperm.xlu0 %2307, %v2729_v33  }
 0x1ae   :  { %v3304_v24 = vpop.permute.xlu1 %458  ;;  %v3306_v6 = vpop.permute.xlu0 %811 }
 0x1af   :  { %5012 = vst [vmem:[#allocation74_spill] sm:$0xff] %v3304_v24  ;;  %5013 = vst [vmem:[#allocation75_spill] sm:$0xff] %v3306_v6  ;;  %1333 = vperm.xlu1 %2300, %v2721_v32  }
 0x1b1   :  { %2321 = vset.pattern.permute.xlu0 %v5003_v13 }
 0x1b2   :  { %v3310_v25 = vpop.permute.xlu1 %972  ;;  %1482 = vperm.xlu0 %2321, %v2662_v22   ;;  %v3313_v27 = vpop.permute.xlu0 %460 }
 0x1b3   :  { %5014 = vst [vmem:[#allocation76_spill] sm:$0xff] %v3310_v25  ;;  %5015 = vst [vmem:[#allocation77_spill] sm:$0xff] %v3313_v27  ;;  %1380 = vrot.lane.b32.xlu1 %v2878_v61, %s2543_s13  ;;  %v2493_v25 = vld [vmem:[%s4814_s3 + $0x28] sm:$0xff] }
 0x1b4   :  { %2306 = vset.pattern.permute.xlu1 %v4998_v10 }
 0x1b6   :  { %v3318_v37 = vpop.permute.xlu1 %813  ;;  %1486 = vperm.xlu0 %2321, %v2713_v30   ;;  %v3321_v24 = vpop.permute.xlu0 %974 }
 0x1b7   :  { %5016 = vst [vmem:[#allocation78_spill] sm:$0xff] %v3318_v37  ;;  %5017 = vst [vmem:[#allocation79_spill] sm:$0xff] %v3321_v24  ;;  %1386 = vrot.lane.b32.xlu1 %v2916_v5, %s2543_s13  ;;  %v1575_v24 = vmul.f32 0.0, %v3008_v7 }
 0x1ba   :  { %v3325_v6 = vpop.permute.xlu1 %717  ;;  %1494 = vperm.xlu0 %2321, %v2721_v32   ;;  %v3328_v22 = vpop.permute.xlu0 %715 }
 0x1bb   :  { %5018 = vst [vmem:[#allocation80_spill] sm:$0xff] %v3325_v6  ;;  %5019 = vst [vmem:[#allocation81_spill] sm:$0xff] %v3328_v22  ;;  %2302 = vrot.lane.b32.xlu1 %v4995_v1, %s2541_s10  ;;  %v1578_v6 = vmul.f32 0.0, %v3017_v2 }
 0x1be   :  { %v3332_v27 = vpop.permute.xlu1 %464  ;;  %1398 = vrot.lane.b32.xlu0 %v3006_v55, %s2543_s13  ;;  %v3336_v10 = vpop.permute.xlu0 %817 }
 0x1bf   :  { %5020 = vst [vmem:[#allocation82_spill] sm:$0xff] %v3332_v27  ;;  %5021 = vst [vmem:[#allocation83_spill] sm:$0xff] %v3336_v10  ;;  %1132 = vperm.xlu1 %2306, %v2729_v33   ;;  %v5033_v27 = vmov 0  }
 0x1c2   :  { %v3340_v37 = vpop.permute.xlu1 %978  ;;  %1625 = vrot.lane.b32.xlu0 %v1575_v24, %s2546_s15  ;;  %v3343_v32 = vpop.permute.xlu0 %466 }
 0x1c3   :  { %5022 = vst [vmem:[#allocation84_spill] sm:$0xff] %v3340_v37  ;;  %5023 = vst [vmem:[#allocation85_spill] sm:$0xff] %v3343_v32  ;;  %1231 = vrot.lane.b32.xlu1 %v2962_v34, %s2541_s10 }
 0x1c4   :  { %2308 = vset.pattern.permute.xlu1 %v5003_v13 }
 0x1c6   :  { %v3349_v22 = vpop.permute.xlu1 %819  ;;  %1631 = vrot.lane.b32.xlu0 %v1578_v6, %s2546_s15  ;;  %v3352_v10 = vpop.permute.xlu0 %980 }
 0x1c7   :  { %5024 = vst [vmem:[#allocation86_spill] sm:$0xff] %v3349_v22  ;;  %5025 = vst [vmem:[#allocation87_spill] sm:$0xff] %v3352_v10  ;;  %1237 = vrot.lane.b32.xlu1 %v3006_v55, %s2541_s10  ;;  %v5030_v10 = vmov 8  }
 0x1ca   :  { %v3356_v37 = vpop.permute.xlu1 %721  ;;  %1724 = vrot.lane.b32.xlu0 %v2916_v5, %s2545_s14  ;;  %v3360_v24 = vpop.permute.xlu0 %723 }
 0x1cb   :  { %5026 = vst [vmem:[#allocation88_spill] sm:$0xff] %v3356_v37  ;;  %5027 = vst [vmem:[#allocation89_spill] sm:$0xff] %v3360_v24  ;;  %1498 = vperm.xlu1 %2308, %v2493_v25   ;;  %v1573_v37 = vmul.f32 %v3008_v7, %v2878_v61 }
 0x1ce   :  { %v3365_v22 = vpop.permute.xlu1 %823  ;;  %2324 = vrot.lane.b32.xlu0 %v4995_v1, %s2541_s10  ;;  %v3369_v6 = vpop.permute.xlu0 %470 }
 0x1cf   :  { %5028 = vst [vmem:[#allocation90_spill] sm:$0xff] %v3365_v22  ;;  %5029 = vst [vmem:[#allocation91_spill] sm:$0xff] %v3369_v6  ;;  %2309 = vset.pattern.permute.xlu1 %v5030_v10  ;;  %v1879_v22 = vld [vmem:[%s4815_s4] sm:$0xff] }
 0x1d0   :  { %1824 = vperm.xlu1 %2309, %v2713_v30   ;;  %v1880_v30 = vld [vmem:[%s4815_s4 + $0x8] sm:$0xff] }
 0x1d2   :  { %1621 = vrot.lane.b32.xlu0 %v1573_v37, %s2546_s15  ;;  %v3376_v24 = vpop.permute.xlu0 %984  ;;  %v3381_v32 = vpop.permute.xlu1 %472 }
 0x1d3   :  { %5031 = vst [vmem:[#allocation92_spill] sm:$0xff] %v3376_v24  ;;  %5032 = vst [vmem:[#allocation93_spill] sm:$0xff] %v3381_v32 }
 0x1d4   :  { %2310 = vset.pattern.permute.xlu1 %v5033_v27 }
 0x1d5   :  { %1889 = vperm.xlu1 %2310, %v1879_v22  }
 0x1d6   :  { %1243 = vrot.lane.b32.xlu0 %v3054_v52, %s2541_s10  ;;  %v3389_v6 = vpop.permute.xlu0 %825  ;;  %v3391_v37 = vpop.permute.xlu1 %986 }
 0x1d7   :  { %5034 = vst [vmem:[#allocation94_spill] sm:$0xff] %v3389_v6  ;;  %5035 = vst [vmem:[#allocation95_spill] sm:$0xff] %v3391_v37  ;;  %v2494_v6 = vld [vmem:[%s4814_s3 + $0x8] sm:$0xff] }
 0x1d9   :  { %1894 = vperm.xlu1 %2310, %v1880_v30   ;;  %v2495_v30 = vld [vmem:[%s4814_s3 + $0x18] sm:$0xff] }
 0x1da   :  { %1502 = vperm.xlu0 %2321, %v2729_v33   ;;  %v3394_v24 = vpop.permute.xlu0 %727  ;;  %v3400_v22 = vpop.permute.xlu1 %729 }
 0x1db   :  { %5036 = vst [vmem:[#allocation96_spill] sm:$0xff] %v3394_v24  ;;  %5037 = vst [vmem:[#allocation97_spill] sm:$0xff] %v3400_v22 }
 0x1dd   :  { %2312 = vrot.lane.b32.xlu1 %v4995_v1, %s2543_s13 }
 0x1de   :  { %2328 = vset.pattern.permute.xlu0 %v5030_v10  ;;  %2322 = vset.pattern.permute.xlu1 %v4994_v11  ;;  %v3407_v33 = vpop.permute.xlu0 %476  ;;  %v3412_v24 = vpop.permute.xlu1 %829 }
 0x1df   :  { %1820 = vperm.xlu0 %2328, %v2494_v6   ;;  %5038 = vst [vmem:[#allocation98_spill] sm:$0xff] %v3407_v33  ;;  %5039 = vst [vmem:[#allocation99_spill] sm:$0xff] %v3412_v24  ;;  %v2496_v6 = vld [vmem:[%s4814_s3 + $0x38] sm:$0xff]  ;;  %v1576_v33 = vmul.f32 %v3017_v2, %v2916_v5  ;;  %v1584_v5 = vmul.f32 0.0, %v3036_v41 }
 0x1e1   :  { %1720 = vrot.lane.b32.xlu1 %v2884_v12, %s2545_s14 }
 0x1e2   :  { %v3416_v11 = vpop.permute.xlu0 %990  ;;  %v3421_v22 = vpop.permute.xlu1 %478 }
 0x1e3   :  { %1828 = vperm.xlu0 %2328, %v2495_v30   ;;  %5040 = vst [vmem:[#allocation100_spill] sm:$0xff] %v3416_v11  ;;  %5041 = vst [vmem:[#allocation101_spill] sm:$0xff] %v3421_v22  ;;  %v1577_v22 = vmul.f32 %v3017_v2, %v2927_v26 }
 0x1e5   :  { %1726 = vrot.lane.b32.xlu1 %v2927_v26, %s2545_s14 }
 0x1e6   :  { %v3430_v30 = vpop.permute.xlu0 %831  ;;  %v3434_v11 = vpop.permute.xlu1 %992 }
 0x1e7   :  { %1836 = vperm.xlu0 %2328, %v2493_v25   ;;  %v1574_v25 = vmul.f32 %v3008_v7, %v2884_v12  ;;  %5042 = vst [vmem:[#allocation102_spill] sm:$0xff] %v3430_v30  ;;  %5043 = vst [vmem:[#allocation103_spill] sm:$0xff] %v3434_v11 }
 0x1e9   :  { %1345 = vperm.xlu1 %2322, %v2496_v6  }
 0x1ea   :  { %v3441_v37 = vpop.permute.xlu0 %1221  ;;  %v3444_v7 = vpop.permute.xlu1 %733 }
 0x1eb   :  { %1406 = vrot.lane.b32.xlu0 %v3065_v9, %s2543_s13  ;;  %5044 = vst [vmem:[#allocation104_spill] sm:$0xff] %v3441_v37  ;;  %5045 = vst [vmem:[#allocation105_spill] sm:$0xff] %v3444_v7  ;;  %v2497_v37 = vld [vmem:[%s4814_s3 + $0x20] sm:$0xff] }
 0x1ed   :  { %1392 = vrot.lane.b32.xlu1 %v2962_v34, %s2543_s13 }
 0x1ee   :  { %2329 = vset.pattern.permute.xlu1 %v5003_v13  ;;  %v1580_v13 = vmul.f32 %v3019_v16, %v2971_v39 }
 0x1ef   :  { %1412 = vrot.lane.b32.xlu0 %v3109_v8, %s2543_s13 }
 0x1f1   :  { %1623 = vrot.lane.b32.xlu1 %v1574_v25, %s2546_s15  ;;  %v3452_v25 = vpop.permute.xlu0 %1227 }
 0x1f3   :  { %2338 = vrot.lane.b32.xlu0 %v4995_v1, %s2545_s14 }
 0x1f5   :  { %1629 = vrot.lane.b32.xlu1 %v1577_v22, %s2546_s15  ;;  %v1583_v22 = vmul.f32 %v3036_v41, %v3015_v56 }
 0x1f7   :  { %1404 = vrot.lane.b32.xlu0 %v3054_v52, %s2543_s13 }
 0x1f9   :  { %1718 = vrot.lane.b32.xlu1 %v2878_v61, %s2545_s14 }
 0x1fb   :  { %v3454_v30 = vpop.permute.xlu1 %1321  ;;  %1635 = vrot.lane.b32.xlu0 %v1580_v13, %s2546_s15 }
 0x1fc   :  { %5046 = vst [vmem:[#allocation106_spill] sm:$0xff] %v3454_v30 }
 0x1fd   :  { %1245 = vrot.lane.b32.xlu1 %v3065_v9, %s2541_s10 }
 0x1ff   :  { %1641 = vrot.lane.b32.xlu0 %v1583_v22, %s2546_s15  ;;  %v3462_v11 = vpop.permute.xlu0 %1128 }
 0x200   :  { %5047 = vst [vmem:[#allocation107_spill] sm:$0xff] %v3462_v11  ;;  %v3464_v7 = vpop.permute.xlu1 %1478 }
 0x201   :  { %5048 = vst [vmem:[#allocation108_spill] sm:$0xff] %v3464_v7  ;;  %1251 = vrot.lane.b32.xlu1 %v3109_v8, %s2541_s10 }
 0x203   :  { %1730 = vrot.lane.b32.xlu0 %v2962_v34, %s2545_s14  ;;  %v3472_v13 = vpop.permute.xlu0 %735 }
 0x204   :  { %5049 = vst [vmem:[#allocation109_spill] sm:$0xff] %v3472_v13 }
 0x205   :  { %1627 = vrot.lane.b32.xlu1 %v1576_v33, %s2546_s15  ;;  %v3475_v32 = vpop.permute.xlu1 %1325  ;;  %v1582_v33 = vmul.f32 %v3036_v41, %v3006_v55 }
 0x206   :  { %5050 = vst [vmem:[#allocation110_spill] sm:$0xff] %v3475_v32 }
 0x207   :  { %1257 = vrot.lane.b32.xlu0 %v3143_v17, %s2541_s10  ;;  %v3479_v22 = vpop.permute.xlu0 %1388 }
 0x208   :  { %5051 = vst [vmem:[#allocation111_spill] sm:$0xff] %v3479_v22  ;;  %v2266_v22 = vunpack.i.h.bf16 %v2920_v53 }
 0x209   :  { %1249 = vrot.lane.b32.xlu1 %v3100_v21, %s2541_s10  ;;  %v3483_v24 = vpop.permute.xlu1 %1329 }
 0x20a   :  { %5052 = vst [vmem:[#allocation112_spill] sm:$0xff] %v3483_v24 }
 0x20b   :  { %1263 = vrot.lane.b32.xlu0 %v3179_v0, %s2541_s10  ;;  %v3487_v2 = vpop.permute.xlu0 %1233 }
 0x20c   :  { %5053 = vst [vmem:[#allocation113_spill] sm:$0xff] %v3487_v2 }
 0x20d   :  { %1506 = vperm.xlu1 %2329, %v2496_v6   ;;  %v3491_v13 = vpop.permute.xlu1 %2288 }
 0x20e   :  { %5054 = vst [vmem:[#allocation114_spill] sm:$0xff] %v3491_v13 }
 0x20f   :  { %1639 = vrot.lane.b32.xlu0 %v1582_v33, %s2546_s15  ;;  %v3494_v32 = vpop.permute.xlu0 %1239  ;;  %v1881_v33 = vld [vmem:[%s4815_s4 + $0x10] sm:$0xff] }
 0x211   :  { %2330 = vset.pattern.permute.xlu1 %v5030_v10  ;;  %v3497_v7 = vpop.permute.xlu1 %1124 }
 0x212   :  { %5055 = vst [vmem:[#allocation115_spill] sm:$0xff] %v3497_v7  ;;  %1832 = vperm.xlu1 %2330, %v2497_v37  }
 0x213   :  { %1261 = vrot.lane.b32.xlu0 %v3168_v54, %s2541_s10  ;;  %v3504_v2 = vpop.permute.xlu0 %1136 }
 0x214   :  { %5056 = vst [vmem:[#allocation116_spill] sm:$0xff] %v3504_v2  ;;  %v2498_v2 = vld [vmem:[%s4814_s3] sm:$0xff] }
 0x215   :  { %v3509_v11 = vpop.permute.xlu1 %1219 }
 0x216   :  { %5057 = vst [vmem:[#allocation117_spill] sm:$0xff] %v3509_v11  ;;  %2331 = vset.pattern.permute.xlu1 %v5033_v27 }
 0x217   :  { %1899 = vperm.xlu1 %2331, %v1881_v33   ;;  %1844 = vperm.xlu0 %2328, %v2496_v6   ;;  %v2499_v6 = vld [vmem:[%s4814_s3 + $0x10] sm:$0xff] }
 0x218   :  { %v3512_v7 = vpop.permute.xlu0 %1317 }
 0x219   :  { %5058 = vst [vmem:[#allocation118_spill] sm:$0xff] %v3512_v7  ;;  %v3517_v12 = vpop.permute.xlu1 %1225 }
 0x21a   :  { %5059 = vst [vmem:[#allocation119_spill] sm:$0xff] %v3517_v12  ;;  %v353_v12 = vlaneseq }
 0x21b   :  { %1904 = vperm.xlu1 %2331, %v1882_v36   ;;  %2348 = vset.pattern.permute.xlu0 %v5033_v27 }
 0x21c   :  { %539 = vperm.xlu0 %2348, %v2498_v2   ;;  %v3523_v11 = vpop.permute.xlu0 %1337  ;;  %v3565_v61 = vand.u32 127, %v353_v12 }
 0x21d   :  { %5060 = vst [vmem:[#allocation120_spill] sm:$0xff] %v3523_v11  ;;  %v3525_v33 = vpop.permute.xlu1 %1490 }
 0x21e   :  { %5061 = vst [vmem:[#allocation121_spill] sm:$0xff] %v3525_v33 }
 0x21f   :  { %2333 = vrot.lane.b32.xlu1 %v4995_v1, %s2543_s13 }
 0x220   :  { %549 = vperm.xlu0 %2348, %v2499_v6   ;;  %v3532_v36 = vpop.permute.xlu0 %1394  ;;  %2347 = vset.pattern.permute.xlu1 %v5030_v10  ;;  %v3548_v6 = vld [vmem:[%s4814_s3 + $0x30] sm:$0xff] }
 0x222   :  { %v3535_v7 = vpop.permute.xlu1 %1816 }
 0x223   :  { %5062 = vst [vmem:[#allocation122_spill] sm:$0xff] %v3535_v7  ;;  %1732 = vrot.lane.b32.xlu1 %v2971_v39, %s2545_s14 }
 0x224   :  { %559 = vperm.xlu0 %2348, %v2497_v37   ;;  %v3539_v2 = vpop.permute.xlu0 %1400  ;;  %v1884_v37 = vld [vmem:[%s4815_s4 + $0x28] sm:$0xff] }
 0x226   :  { %v3541_v11 = vpop.permute.xlu1 %1382 }
 0x227   :  { %5063 = vst [vmem:[#allocation123_spill] sm:$0xff] %v3541_v11  ;;  %1738 = vrot.lane.b32.xlu1 %v3015_v56, %s2545_s14  ;;  %v1581_v56 = vmul.f32 0.0, %v3019_v16 }
 0x228   :  { %569 = vperm.xlu0 %2348, %v3548_v6   ;;  %v3551_v10 = vpop.permute.xlu0 %2317 }
 0x22a   :  { %v3556_v7 = vpop.permute.xlu1 %2296 }
 0x22b   :  { %1410 = vrot.lane.b32.xlu1 %v3100_v21, %s2543_s13 }
 0x22c   :  { %1914 = vperm.xlu0 %2348, %v1884_v37   ;;  %v3560_v11 = vpop.permute.xlu0 %1341  ;;  %v2222_v37 = vunpack.i.h.bf16 %v2779_v44 }
 0x22d   :  { %5064 = vst [vmem:[#allocation124_spill] sm:$0xff] %v3560_v11  ;;  %v360_v11 = vand.u32 15, %v3565_v61 }
 0x22e   :  { %v3563_v39 = vpop.permute.xlu1 %1333  ;;  %v487_v12 = vsel %vm480_vm1, %v2222_v37, %v3276_v31 }
 0x22f   :  { %5065 = vst [vmem:[#allocation125_spill] sm:$0xff] %v3563_v39  ;;  %1637 = vrot.lane.b32.xlu1 %v1581_v56, %s2546_s15  ;;  %v2244_v39 = vunpack.i.h.bf16 %v2896_v20  ;;  %vm3587_vm2 = vcmp.ge.s32.totalorder %v360_v11, 1  ;;  %vm3609_vm4 = vcmp.le.s32.totalorder %v360_v11, 14  ;;  %v1001_v11 = vsel %vm994_vm5, %v2266_v22, %v3283_v28 }
 0x230   :  { %1424 = vrot.lane.b32.xlu0 %v3179_v0, %s2543_s13 }
 0x231   :  { %v3571_v30 = vpop.permute.xlu0 %1482  ;;  %v840_v37 = vsel %vm833_vm3, %v2244_v39, %v3274_v29 }
 0x232   :  { %5066 = vst [vmem:[#allocation126_spill] sm:$0xff] %v3571_v30  ;;  %v3573_v26 = vpop.permute.xlu1 %1380  ;;  %v743_v30 = vsel %vm87_vm0, %v3117_v4, %v3297_v62  ;;  %v872_v39 = vsel %vm3609_vm4, %v840_v37, 0.0  ;;  %v1579_v4 = vmul.f32 %v3019_v16, %v2962_v34  ;;  %v1033_v16 = vsel %vm3587_vm2, %v1001_v11, 0.0 }
 0x233   :  { %5067 = vst [vmem:[#allocation127_spill] sm:$0xff] %v3573_v26  ;;  %1643 = vrot.lane.b32.xlu1 %v1584_v5, %s2546_s15  ;;  %v519_v5 = vsel %vm3587_vm2, %v487_v12, 0.0  ;;  %v920_v37 = vmul.f32 %v2876_v60, %v872_v39  ;;  %v1145_v11 = vmul.f32 %v3172_v59, %v3006_v55 }
 0x234   :  { %2356 = vrot.lane.b32.xlu0 %v4995_v1, %s2545_s14  ;;  %v583_v20 = vmul.f32 %v2792_v51, %v519_v5  ;;  %v1589_v5 = vmul.f32 %v3049_v38, %v3109_v8 }
 0x235   :  { %v3582_v56 = vpop.permute.xlu0 %1486 }
 0x236   :  { %v3584_v41 = vpop.permute.xlu1 %1386 }
 0x237   :  { %5068 = vst [vmem:[#allocation128_spill] sm:$0xff] %v3584_v41  ;;  %1736 = vrot.lane.b32.xlu1 %v3006_v55, %s2545_s14  ;;  %v1586_v41 = vmul.f32 %v3029_v23, %v3065_v9  ;;  %v1883_v55 = vld [vmem:[%s4815_s4 + $0x20] sm:$0xff] }
 0x238   :  { %1416 = vrot.lane.b32.xlu0 %v3136_v3, %s2543_s13 }
 0x239   :  { %v3599_v31 = vpop.permute.xlu0 %1494 }
 0x23a   :  { %5071 = vst [vmem:[#allocation129_spill] sm:$0xff] %v3599_v31  ;;  %v3606_v21 = vpop.permute.xlu1 %2302  ;;  %v775_v31 = vadd.f32 %v743_v30, %v583_v20 }
 0x23b   :  { %5072 = vst [vmem:[#allocation130_spill] sm:$0xff] %v3606_v21  ;;  %2343 = vrot.lane.b32.xlu1 %v4995_v1, %s2541_s10 }
 0x23c   :  { %1647 = vrot.lane.b32.xlu0 %v1586_v41, %s2546_s15  ;;  %v936_v20 = vadd.f32 %v920_v37, %v775_v31  ;;  %v1081_v41 = vmul.f32 %v3071_v49, %v1033_v16 }
 0x23d   :  { %v1399_v21 = vpop.permute.xlu0 %1398 }
 0x23e   :  { %v1435_v51 = vsel %vm1428_vm6, %v1399_v21, %v3539_v2  ;;  %v3627_v62 = vpop.permute.xlu1 %1132  ;;  %v1097_v21 = vadd.f32 %v1081_v41, %v936_v20 }
 0x23f   :  { %5075 = vst [vmem:[#allocation131_spill] sm:$0xff] %v3627_v62  ;;  %1633 = vrot.lane.b32.xlu1 %v1579_v4, %s2546_s15  ;;  %v1585_v4 = vmul.f32 %v3029_v23, %v3054_v52  ;;  %v1467_v37 = vsel %vm3587_vm2, %v1435_v51, 0.0 }
 0x240   :  { %1653 = vrot.lane.b32.xlu0 %v1589_v5, %s2546_s15  ;;  %v1161_v20 = vadd.f32 %v1145_v11, %v1097_v21  ;;  %v1515_v51 = vmul.f32 %v3525_v33, %v1467_v37  ;;  %v1593_v37 = vmul.f32 0.0, %v3042_v40  ;;  %v5099_v33 = vld [vmem:[#allocation26_spill] sm:$0xff] }
 0x241   :  { %v3634_v30 = vpop.permute.xlu0 %1625 }
 0x242   :  { %5076 = vst [vmem:[#allocation132_spill] sm:$0xff] %v3634_v30  ;;  %v3636_v22 = vpop.permute.xlu1 %1231 }
 0x243   :  { %5077 = vst [vmem:[#allocation133_spill] sm:$0xff] %v3636_v22  ;;  %1255 = vrot.lane.b32.xlu1 %v3136_v3, %s2541_s10 }
 0x244   :  { %1742 = vrot.lane.b32.xlu0 %v3054_v52, %s2545_s14 }
 0x245   :  { %v3643_v39 = vpop.permute.xlu0 %1631 }
 0x246   :  { %v1238_v31 = vpop.permute.xlu1 %1237 }
 0x247   :  { %v1274_v5 = vsel %vm1267_vm7, %v1238_v31, %v3494_v32  ;;  %1840 = vperm.xlu1 %2347, %v3548_v6   ;;  %v1885_v6 = vld [vmem:[%s4815_s4 + $0x30] sm:$0xff] }
 0x248   :  { %v1306_v16 = vsel %vm3609_vm4, %v1274_v5, 0.0  ;;  %1645 = vrot.lane.b32.xlu0 %v1585_v4, %s2546_s15 }
 0x249   :  { %v1354_v41 = vmul.f32 %v3483_v24, %v1306_v16  ;;  %v1725_v62 = vpop.permute.xlu0 %1724  ;;  %v355_v16 = vadd.s32 128, %v3565_v61  ;;  %v2260_v24 = vunpack.i.l.bf16 %v5099_v33 }
 0x24a   :  { %v3664_v31 = vpop.permute.xlu1 %1498 }
 0x24b   :  { %5078 = vst [vmem:[#allocation134_spill] sm:$0xff] %v3664_v31  ;;  %v1370_v30 = vadd.f32 %v1354_v41, %v1161_v20  ;;  %2349 = vset.pattern.permute.xlu1 %v5033_v27 }
 0x24c   :  { %1909 = vperm.xlu1 %2349, %v1883_v55   ;;  %1919 = vperm.xlu0 %2348, %v1885_v6   ;;  %v1596_v55 = vmul.f32 0.0, %v3119_v46  ;;  %v367_v6 = vand.u32 15, %v355_v16 }
 0x24d   :  { %v3668_v21 = vpop.permute.xlu0 %2324  ;;  %v3670_v4 = vadd.f32 %v1515_v51, %v1370_v30  ;;  %v484_v51 = vsel %vm480_vm1, %v3213_v43, %v3222_v63 }
 0x24e   :  { %vm3704_vm8 = vcmp.ge.s32.totalorder %v367_v6, 1  ;;  %vm3741_vm10 = vcmp.le.s32.totalorder %v367_v6, 14 }
 0x24f   :  { %5079 = vst [vmem:[#allocation135_spill] sm:$0xff] %v3670_v4  ;;  %v3672_v11 = vpop.permute.xlu1 %1824  ;;  %v516_v16 = vsel %vm3704_vm8, %v484_v51, 0.0 }
 0x250   :  { %5080 = vst [vmem:[#allocation136_spill] sm:$0xff] %v3672_v11  ;;  %1418 = vrot.lane.b32.xlu1 %v3143_v17, %s2543_s13  ;;  %1756 = vrot.lane.b32.xlu0 %v3143_v17, %s2545_s14  ;;  %v580_v22 = vmul.f32 %v2787_v48, %v516_v16 }
 0x251   :  { %v3678_v5 = vpop.permute.xlu0 %1621 }
 0x252   :  { %5081 = vst [vmem:[#allocation137_spill] sm:$0xff] %v3678_v5 }
 0x254   :  { %2351 = vrot.lane.b32.xlu1 %v4995_v1, %s2543_s13  ;;  %v3682_v27 = vpop.permute.xlu1 %1889  ;;  %1762 = vrot.lane.b32.xlu0 %v3179_v0, %s2545_s14 }
 0x255   :  { %5082 = vst [vmem:[#allocation138_spill] sm:$0xff] %v3682_v27  ;;  %v3686_v30 = vpop.permute.xlu0 %1243 }
 0x258   :  { %1744 = vrot.lane.b32.xlu1 %v3065_v9, %s2545_s14  ;;  %v3692_v20 = vpop.permute.xlu1 %1894  ;;  %1661 = vrot.lane.b32.xlu0 %v1593_v37, %s2546_s15 }
 0x259   :  { %v3695_v41 = vpop.permute.xlu0 %1502 }
 0x25a   :  { %5083 = vst [vmem:[#allocation139_spill] sm:$0xff] %v3695_v41  ;;  %v2319_v41 = vunpack.i.l.bf16 %v3551_v10 }
 0x25c   :  { %1750 = vrot.lane.b32.xlu1 %v3109_v8, %s2545_s14  ;;  %v2313_v61 = vpop.permute.xlu1 %2312  ;;  %1667 = vrot.lane.b32.xlu0 %v1596_v55, %s2546_s15  ;;  %v837_v55 = vsel %vm833_vm3, %v3215_v50, %v3229_v42 }
 0x25d   :  { %v2315_v4 = vunpack.i.h.bf16 %v2313_v61  ;;  %v2314_v27 = vunpack.i.l.bf16 %v2313_v61 }
 0x25e   :  { %v1821_v37 = vpop.permute.xlu0 %1820 }
 0x25f   :  { %v1434_v63 = vsel %vm1428_vm6, %v3532_v36, %v2314_v27  ;;  %v3715_v31 = vsel %vm1428_vm6, %v3539_v2, %v2315_v4  ;;  %v740_v2 = vsel %vm87_vm0, %v3236_v58, %v3238_v19  ;;  %v1587_v27 = vmul.f32 0.0, %v3029_v23 }
 0x260   :  { %5086 = vst [vmem:[#allocation140_spill] sm:$0xff] %v3715_v31  ;;  %v1466_v61 = vsel %vm3704_vm8, %v1434_v63, 0.0  ;;  %1422 = vrot.lane.b32.xlu1 %v3168_v54, %s2543_s13  ;;  %v3724_v51 = vpop.permute.xlu1 %1720  ;;  %1760 = vrot.lane.b32.xlu0 %v3168_v54, %s2545_s14  ;;  %v1594_v63 = vmul.f32 %v3119_v46, %v3168_v54  ;;  %v869_v19 = vsel %vm3741_vm10, %v837_v55, 0.0  ;;  %v998_v23 = vsel %vm994_vm5, %v3220_v35, %v3231_v14 }
 0x261   :  { %5087 = vst [vmem:[#allocation141_spill] sm:$0xff] %v3724_v51  ;;  %v3733_v4 = vsel %vm1766_vm9, %v3724_v51, %v2319_v41  ;;  %v3736_v42 = vmul.f32 %v3582_v56, %v1466_v61  ;;  %v2320_v41 = vunpack.i.h.bf16 %v3551_v10  ;;  %v772_v61 = vadd.f32 %v740_v2, %v580_v22  ;;  %v2042_v10 = vld [vmem:[%s4817_s6 + $0x8] sm:$0xff] }
 0x262   :  { %5088 = vst [vmem:[#allocation142_spill] sm:$0xff] %v3733_v4  ;;  %v3746_v9 = vpop.permute.xlu0 %1828  ;;  %v2291_v54 = vunpack.i.h.bf16 %v3491_v13  ;;  %v1590_v55 = vmul.f32 0.0, %v3049_v38  ;;  %v917_v14 = vmul.f32 %v2929_v15, %v869_v19  ;;  %v2299_v19 = vunpack.i.h.bf16 %v3556_v7  ;;  %v5098_v4 = vld [vmem:[#allocation37_spill] sm:$0xff] }
 0x263   :  { %5089 = vst [vmem:[#allocation143_spill] sm:$0xff] %v3736_v42  ;;  %5092 = vst [vmem:[#allocation144_spill] sm:$0xff] %v3746_v9 }
 0x264   :  { %1649 = vrot.lane.b32.xlu1 %v1587_v27, %s2546_s15  ;;  %v1727_v6 = vpop.permute.xlu1 %1726  ;;  %1663 = vrot.lane.b32.xlu0 %v1594_v63, %s2546_s15  ;;  %v1271_v42 = vsel %vm1267_vm7, %v3452_v25, %v2291_v54 }
 0x265   :  { %v1769_v16 = vsel %vm1766_vm9, %v1725_v62, %v1727_v6  ;;  %v1770_v9 = vsel %vm1766_vm9, %v1727_v6, %v2320_v41  ;;  %v1030_v62 = vsel %vm3704_vm8, %v998_v23, 0.0  ;;  %v933_v6 = vadd.f32 %v917_v14, %v772_v61  ;;  %v5097_v61 = vld [vmem:[#allocation111_spill] sm:$0xff] }
 0x266   :  { %v1801_v22 = vsel %vm3609_vm4, %v1769_v16, 0.0  ;;  %v1802_v2 = vsel %vm3741_vm10, %v1770_v9, 0.0  ;;  %v3768_v27 = vpop.permute.xlu0 %1836  ;;  %v2216_v23 = vunpack.i.l.bf16 %v2781_v45  ;;  %v1078_v14 = vmul.f32 %v2957_v57, %v1030_v62 }
 0x267   :  { %5093 = vst [vmem:[#allocation145_spill] sm:$0xff] %v3768_v27  ;;  %v3772_v63 = vmul.f32 %v1821_v37, %v1801_v22  ;;  %v3774_v41 = vmul.f32 %v1821_v37, %v1802_v2  ;;  %v2217_v27 = vunpack.i.h.bf16 %v2781_v45  ;;  %v2239_v22 = vunpack.i.h.bf16 %v2839_v18  ;;  %v5095_v2 = vld [vmem:[#allocation16_spill] sm:$0xff] }
 0x268   :  { %1655 = vrot.lane.b32.xlu1 %v1590_v55, %s2546_s15  ;;  %v3780_v16 = vpop.permute.xlu1 %1345  ;;  %2050 = vperm.xlu0 %2348, %v2042_v10   ;;  %v2238_v55 = vunpack.i.l.bf16 %v2839_v18  ;;  %v1303_v9 = vsel %vm3741_vm10, %v1271_v42, 0.0  ;;  %v1094_v37 = vadd.f32 %v1078_v14, %v933_v6  ;;  %v1432_v62 = vsel %vm1428_vm6, %v5097_v61, %v2299_v19  ;;  %v5101_v6 = vld [vmem:[#allocation50_spill] sm:$0xff]  ;;  %v5103_v18 = vld [vmem:[#allocation28_spill] sm:$0xff] }
 0x269   :  { %5094 = vst [vmem:[#allocation146_spill] sm:$0xff] %v3780_v16  ;;  %v5096_v16 = vld [vmem:[#allocation10_spill] sm:$0xff]  ;;  %v483_v45 = vsel %vm480_vm1, %v2217_v27, %v3213_v43  ;;  %v2261_v10 = vunpack.i.h.bf16 %v5099_v33  ;;  %v1588_v43 = vmul.f32 %v3049_v38, %v5098_v4  ;;  %v5100_v27 = vld [vmem:[#allocation20_spill] sm:$0xff] }
 0x26a   :  { %v3788_v54 = vpop.permute.xlu0 %1406  ;;  %v1142_v14 = vmul.f32 %v5101_v6, %v5100_v27  ;;  %v5102_v19 = vld [vmem:[#allocation106_spill] sm:$0xff]  ;;  %v515_v33 = vsel %vm3587_vm2, %v483_v45, 0.0  ;;  %v5108_v45 = vld [vmem:[#allocation13_spill] sm:$0xff] }
 0x26b   :  { %v1351_v51 = vmul.f32 %v5102_v19, %v1303_v9  ;;  %v836_v9 = vsel %vm833_vm3, %v2239_v22, %v3215_v50  ;;  %v3846_v22 = vmul.f32 %v3119_v46, %v3179_v0 }
 0x26c   :  { %1748 = vrot.lane.b32.xlu1 %v5098_v4, %s2545_s14  ;;  %v1393_v52 = vpop.permute.xlu1 %1392  ;;  %v1158_v27 = vadd.f32 %v1142_v14, %v1094_v37  ;;  %v1886_v37 = vld [vmem:[%s4815_s4 + $0x38] sm:$0xff]  ;;  %v868_v46 = vsel %vm3609_vm4, %v836_v9, 0.0 }
 0x26d   :  { %v1433_v42 = vsel %vm1428_vm6, %v1393_v52, %v3532_v36  ;;  %v1464_v52 = vsel %vm3704_vm8, %v1432_v62, 0.0  ;;  %v3834_v62 = vmul.f32 %v3042_v40, %v3136_v3 }
 0x26e   :  { %v1465_v31 = vsel %vm3587_vm2, %v1433_v42, 0.0  ;;  %v3814_v8 = vpop.permute.xlu0 %1412  ;;  %v5105_v42 = vld [vmem:[#allocation126_spill] sm:$0xff]  ;;  %v1367_v36 = vadd.f32 %v1351_v51, %v1158_v27  ;;  %v5111_v51 = vld [vmem:[#allocation48_spill] sm:$0xff] }
 0x26f   :  { %v3822_v38 = vmul.f32 %v3582_v56, %v1465_v31  ;;  %v1512_v4 = vmul.f32 %v5105_v42, %v1464_v52  ;;  %v1592_v56 = vmul.f32 %v3042_v40, %v3143_v17  ;;  %v5106_v31 = vld [vmem:[#allocation38_spill] sm:$0xff]  ;;  %v579_v52 = vmul.f32 %v2787_v48, %v515_v33  ;;  %v5113_v27 = vld [vmem:[#allocation24_spill] sm:$0xff] }
 0x270   :  { %1651 = vrot.lane.b32.xlu1 %v1588_v43, %s2546_s15  ;;  %v3829_v13 = vpop.permute.xlu1 %1623  ;;  %v739_v50 = vsel %vm87_vm0, %v5106_v31, %v3236_v58  ;;  %v5107_v43 = vld [vmem:[#allocation18_spill] sm:$0xff]  ;;  %v3871_v33 = vmul.f32 %v5111_v51, %v2962_v34  ;;  %v916_v34 = vmul.f32 %v2929_v15, %v868_v46  ;;  %v5121_v46 = vld [vmem:[#allocation119_spill] sm:$0xff] }
 0x271   :  { %5104 = vst [vmem:[#allocation16_spill] sm:$0xff] %v3822_v38  ;;  %v3850_v14 = vmul.f32 %v5101_v6, %v5107_v43  ;;  %v5109_v17 = vld [vmem:[#allocation46_spill] sm:$0xff]  ;;  %v997_v6 = vsel %vm994_vm5, %v2261_v10, %v3220_v35  ;;  %v771_v43 = vadd.f32 %v739_v50, %v579_v52  ;;  %v1528_v0 = vadd.f32 %v1512_v4, %v1367_v36  ;;  %v5116_v4 = vld [vmem:[#allocation53_spill] sm:$0xff]  ;;  %v5117_v36 = vld [vmem:[#allocation55_spill] sm:$0xff] }
 0x272   :  { %v3853_v40 = vpop.permute.xlu0 %2338  ;;  %v3857_v58 = vmul.f32 %v5109_v17, %v5108_v45  ;;  %v5110_v31 = vld [vmem:[#allocation14_spill] sm:$0xff]  ;;  %5112 = vst [vmem:[#allocation10_spill] sm:$0xff] %v3871_v33  ;;  %v5115_v45 = vld [vmem:[#allocation52_spill] sm:$0xff]  ;;  %v3884_v10 = vsel %vm480_vm1, %v2216_v23, %v5116_v4  ;;  %v995_v50 = vsel %vm994_vm5, %v2260_v24, %v5117_v36  ;;  %v5120_v24 = vld [vmem:[#allocation57_spill] sm:$0xff] }
 0x273   :  { %v3861_v38 = vmul.f32 %v5109_v17, %v5110_v31  ;;  %v3875_v17 = vmul.f32 %v5111_v51, %v5113_v27  ;;  %v834_v9 = vsel %vm833_vm3, %v2238_v55, %v5115_v45  ;;  %v5118_v31 = vld [vmem:[#allocation29_spill] sm:$0xff]  ;;  %v5119_v55 = vld [vmem:[#allocation56_spill] sm:$0xff]  ;;  %v835_v15 = vsel %vm833_vm3, %v5115_v45, %v5120_v24 }
 0x274   :  { %1924 = vperm.xlu1 %2349, %v1886_v37   ;;  %v3867_v48 = vpop.permute.xlu1 %1629  ;;  %v3891_v51 = vmul.f32 %v3172_v59, %v5118_v31  ;;  %v996_v27 = vsel %vm994_vm5, %v5117_v36, %v5119_v55  ;;  %v1270_v59 = vsel %vm1267_vm7, %v5121_v46, %v3452_v25  ;;  %v5125_v55 = vld [vmem:[#allocation69_spill] sm:$0xff]  ;;  %v5126_v24 = vld [vmem:[#allocation68_spill] sm:$0xff] }
 0x275   :  { %5114 = vst [vmem:[#allocation111_spill] sm:$0xff] %v3875_v17  ;;  %v1673_v35 = vsel %vm1669_vm11, %v3867_v48, %v3643_v39  ;;  %v1029_v39 = vsel %vm3587_vm2, %v997_v6, 0.0  ;;  %v866_v6 = vsel %vm3609_vm4, %v834_v9, 0.0  ;;  %v488_v46 = vsel %vm480_vm1, %v5126_v24, %v5125_v55 }
 0x276   :  { %v1705_v37 = vadd.f32 %v1673_v35, %v1528_v0  ;;  %v1405_v52 = vpop.permute.xlu0 %1404  ;;  %v932_v0 = vadd.f32 %v916_v34, %v771_v43  ;;  %v1027_v43 = vsel %vm3587_vm2, %v995_v50, 0.0  ;;  %v1077_v45 = vmul.f32 %v2957_v57, %v1029_v39  ;;  %v5123_v34 = vld [vmem:[#allocation128_spill] sm:$0xff]  ;;  %v5127_v39 = vld [vmem:[#allocation11_spill] sm:$0xff] }
 0x277   :  { %v3900_v23 = vsel %vm1428_vm6, %v1405_v52, %v3788_v54  ;;  %v5122_v52 = vld [vmem:[#allocation54_spill] sm:$0xff]  ;;  %v1431_v9 = vsel %vm1428_vm6, %v5123_v34, %v5097_v61  ;;  %v867_v50 = vsel %vm3741_vm10, %v835_v15, 0.0  ;;  %v2326_v57 = vunpack.i.l.bf16 %v3668_v21  ;;  %v5128_v61 = vld [vmem:[#allocation31_spill] sm:$0xff] }
 0x278   :  { %v1866_v35 = vadd.f32 %v3774_v41, %v1705_v37  ;;  %2361 = vrot.lane.b32.xlu1 %v4995_v1, %s2545_s14  ;;  %v3911_v36 = vpop.permute.xlu1 %1718  ;;  %v3918_v31 = vsel %vm480_vm1, %v5116_v4, %v5122_v52  ;;  %v1028_v41 = vsel %vm3704_vm8, %v996_v27, 0.0  ;;  %v1302_v27 = vsel %vm3609_vm4, %v1270_v59, 0.0 }
 0x279   :  { %v3945_v52 = vmul.f32 %v5127_v39, %v866_v6  ;;  %v3948_v34 = vmul.f32 %v5128_v61, %v1027_v43  ;;  %v3955_v55 = vmul.f32 %v5128_v61, %v1028_v41  ;;  %v1463_v59 = vsel %vm3587_vm2, %v1431_v9, 0.0 }
 0x27a   :  { %v3931_v37 = vpop.permute.xlu0 %1635  ;;  %v3934_v4 = vadd.f32 %v3692_v20, %v1866_v35  ;;  %v1093_v35 = vadd.f32 %v1077_v45, %v932_v0  ;;  %v5129_v0 = vld [vmem:[#allocation59_spill] sm:$0xff]  ;;  %v5130_v45 = vld [vmem:[#allocation32_spill] sm:$0xff]  ;;  %v520_v41 = vsel %vm3704_vm8, %v488_v46, 0.0  ;;  %v1350_v9 = vmul.f32 %v5102_v19, %v1302_v27 }
 0x27b   :  { %5124 = vst [vmem:[#allocation26_spill] sm:$0xff] %v3931_v37  ;;  %v3972_v24 = vsel %vm87_vm0, %v5130_v45, %v5129_v0  ;;  %v5133_v15 = vunpack.i.l.bf16 %v5095_v2  ;;  %v5136_v45 = vld [vmem:[#allocation71_spill] sm:$0xff]  ;;  %v2327_v46 = vunpack.i.h.bf16 %v3668_v21  ;;  %v5138_v27 = vunpack.i.l.bf16 %v2920_v53  ;;  %v5139_v2 = vld [vmem:[#allocation73_spill] sm:$0xff] }
 0x27c   :  { %1659 = vrot.lane.b32.xlu1 %v1592_v56, %s2546_s15  ;;  %v1246_v25 = vpop.permute.xlu1 %1245  ;;  %v3967_v56 = vmul.f32 %v5127_v39, %v867_v50  ;;  %v5135_v50 = vunpack.i.l.bf16 %v2779_v44  ;;  %v841_v1 = vsel %vm833_vm3, %v3274_v29, %v5136_v45  ;;  %v5137_v19 = vld [vmem:[#allocation63_spill] sm:$0xff]  ;;  %v1157_v44 = vadd.f32 %v3850_v14, %v1093_v35  ;;  %v5141_v29 = vld [vmem:[#allocation64_spill] sm:$0xff]  ;;  %v5142_v45 = vld [vmem:[#allocation65_spill] sm:$0xff] }
 0x27d   :  { %v3961_v6 = vsel %vm1267_vm7, %v3686_v30, %v1246_v25  ;;  %v3964_v43 = vsel %vm1267_vm7, %v1246_v25, %v2326_v57  ;;  %v5132_v30 = vld [vmem:[#allocation60_spill] sm:$0xff]  ;;  %v5134_v57 = vld [vmem:[#allocation61_spill] sm:$0xff]  ;;  %v999_v33 = vsel %vm994_vm5, %v5138_v27, %v5137_v19  ;;  %v1000_v21 = vsel %vm994_vm5, %v5137_v19, %v5141_v29  ;;  %v5143_v27 = vld [vmem:[#allocation7_spill] sm:$0xff] }
 0x27e   :  { %v3977_v61 = vpop.permute.xlu0 %1641  ;;  %v838_v25 = vsel %vm833_vm3, %v5133_v15, %v5132_v30  ;;  %v3987_v39 = vsel %vm480_vm1, %v5135_v50, %v5134_v57  ;;  %v1511_v50 = vmul.f32 %v5105_v42, %v1463_v59  ;;  %v839_v53 = vsel %vm833_vm3, %v5132_v30, %v5142_v45  ;;  %v5144_v14 = vld [vmem:[#allocation62_spill] sm:$0xff] }
 0x27f   :  { %5131 = vst [vmem:[#allocation20_spill] sm:$0xff] %v3977_v61  ;;  %v5140_v61 = vld [vmem:[#allocation72_spill] sm:$0xff]  ;;  %v584_v17 = vmul.f32 %v5143_v27, %v520_v41  ;;  %v870_v42 = vsel %vm3609_vm4, %v838_v25, 0.0  ;;  %v873_v35 = vsel %vm3741_vm10, %v841_v1, 0.0  ;;  %v1366_v59 = vadd.f32 %v1350_v9, %v1157_v44  ;;  %v5146_v30 = vld [vmem:[#allocation58_spill] sm:$0xff] }
 0x280   :  { %v744_v15 = vsel %vm87_vm0, %v5140_v61, %v5139_v2  ;;  %1665 = vrot.lane.b32.xlu1 %v3846_v22, %s2546_s15  ;;  %v1252_v37 = vpop.permute.xlu1 %1251  ;;  %v4019_v22 = vsel %vm480_vm1, %v5134_v57, %v5144_v14  ;;  %v4028_v41 = vsel %vm87_vm0, %v5129_v0, %v5146_v30  ;;  %v5147_v25 = vld [vmem:[#allocation70_spill] sm:$0xff]  ;;  %v1032_v29 = vsel %vm3704_vm8, %v1000_v21, 0.0  ;;  %v5148_v44 = vld [vmem:[#allocation12_spill] sm:$0xff]  ;;  %v5150_v21 = vld [vmem:[#allocation25_spill] sm:$0xff] }
 0x281   :  { %v4012_v61 = vsel %vm1267_vm7, %v1252_v37, %v2327_v46  ;;  %v1031_v46 = vsel %vm3587_vm2, %v999_v33, 0.0  ;;  %v1002_v2 = vsel %vm994_vm5, %v3283_v28, %v5147_v25  ;;  %v776_v57 = vadd.f32 %v744_v15, %v584_v17  ;;  %v5152_v27 = vld [vmem:[#allocation82_spill] sm:$0xff] }
 0x282   :  { %v4023_v19 = vpop.permute.xlu0 %1730  ;;  %v871_v1 = vsel %vm3741_vm10, %v839_v53, 0.0  ;;  %v1527_v0 = vadd.f32 %v1511_v50, %v1366_v59  ;;  %v4045_v45 = vmul.f32 %v5148_v44, %v870_v42  ;;  %v921_v28 = vmul.f32 %v2876_v60, %v873_v35  ;;  %v5170_v15 = vld [vmem:[#allocation86_spill] sm:$0xff] }
 0x283   :  { %5145 = vst [vmem:[#allocation50_spill] sm:$0xff] %v4023_v19  ;;  %v4054_v53 = vmul.f32 %v5150_v21, %v1031_v46  ;;  %v1034_v50 = vsel %vm3704_vm8, %v1002_v2, 0.0  ;;  %v5153_v14 = vunpack.i.h.bf16 %v2785_v47  ;;  %v4068_v35 = vmul.f32 %v5148_v44, %v871_v1  ;;  %v5155_v46 = vld [vmem:[#allocation85_spill] sm:$0xff]  ;;  %v5156_v2 = vld [vmem:[#allocation67_spill] sm:$0xff]  ;;  %v5174_v19 = vld [vmem:[#allocation8_spill] sm:$0xff] }
 0x284   :  { %1754 = vrot.lane.b32.xlu1 %v3136_v3, %s2545_s14  ;;  %v1628_v9 = vpop.permute.xlu1 %1627  ;;  %5149 = vst [vmem:[#allocation106_spill] sm:$0xff] %v4045_v45  ;;  %v937_v30 = vadd.f32 %v921_v28, %v776_v57  ;;  %v492_v25 = vsel %vm480_vm1, %v5152_v27, %v5155_v46  ;;  %v1082_v28 = vmul.f32 %v3071_v49, %v1034_v50  ;;  %v5166_v50 = vld [vmem:[#allocation83_spill] sm:$0xff]  ;;  %v5171_v3 = vld [vmem:[#allocation88_spill] sm:$0xff] }
 0x285   :  { %v1672_v17 = vsel %vm1669_vm11, %v1628_v9, %v3867_v48  ;;  %5151 = vst [vmem:[#allocation28_spill] sm:$0xff] %v4054_v53  ;;  %v491_v42 = vsel %vm480_vm1, %v5153_v14, %v5152_v27  ;;  %v4065_v48 = vmul.f32 %v5150_v21, %v1032_v29  ;;  %v5157_v9 = vld [vmem:[#allocation34_spill] sm:$0xff]  ;;  %v5160_v29 = vld [vmem:[#allocation75_spill] sm:$0xff]  ;;  %v5163_v27 = vunpack.i.l.bf16 %v2785_v47 }
 0x286   :  { %v1704_v59 = vadd.f32 %v1672_v17, %v1527_v0  ;;  %v4062_v60 = vpop.permute.xlu0 %1257  ;;  %v4076_v33 = vsel %vm87_vm0, %v5157_v9, %v5156_v2  ;;  %v5159_v14 = vld [vmem:[#allocation66_spill] sm:$0xff]  ;;  %v5161_v17 = vunpack.i.l.bf16 %v5096_v16  ;;  %v5167_v47 = vunpack.i.h.bf16 %v5096_v16  ;;  %v5172_v16 = vld [vmem:[#allocation41_spill] sm:$0xff] }
 0x287   :  { %5154 = vst [vmem:[#allocation126_spill] sm:$0xff] %v4062_v60  ;;  %5158 = vst [vmem:[#allocation38_spill] sm:$0xff] %v4076_v33  ;;  %v4081_v0 = vsel %vm87_vm0, %v5156_v2, %v5159_v14  ;;  %v5162_v21 = vld [vmem:[#allocation74_spill] sm:$0xff]  ;;  %v523_v2 = vsel %vm3587_vm2, %v491_v42, 0.0  ;;  %v524_v42 = vsel %vm3704_vm8, %v492_v25, 0.0  ;;  %v5173_v60 = vld [vmem:[#allocation77_spill] sm:$0xff] }
 0x288   :  { %v842_v1 = vsel %vm833_vm3, %v5161_v17, %v5160_v29  ;;  %v1865_v57 = vadd.f32 %v3772_v63, %v1704_v59  ;;  %1657 = vrot.lane.b32.xlu1 %v3834_v62, %s2546_s15  ;;  %v1250_v44 = vpop.permute.xlu1 %1249  ;;  %v4095_v46 = vsel %vm480_vm1, %v5163_v27, %v5162_v21  ;;  %v2041_v63 = vld [vmem:[%s4817_s6] sm:$0xff]  ;;  %v5164_v62 = vld [vmem:[#allocation76_spill] sm:$0xff]  ;;  %v5165_v59 = vunpack.i.l.bf16 %v5103_v18  ;;  %v5184_v33 = vld [vmem:[#allocation87_spill] sm:$0xff] }
 0x289   :  { %v4100_v9 = vsel %vm1267_vm7, %v1250_v44, %v1252_v37  ;;  %v844_v14 = vsel %vm833_vm3, %v5167_v47, %v5166_v50  ;;  %v1098_v44 = vadd.f32 %v1082_v28, %v937_v30  ;;  %v874_v27 = vsel %vm3609_vm4, %v842_v1, 0.0 }
 0x28a   :  { %v1003_v49 = vsel %vm994_vm5, %v5165_v59, %v5164_v62  ;;  %v4115_v17 = vpop.permute.xlu0 %1263  ;;  %v4118_v37 = vadd.f32 %v3692_v20, %v1865_v57  ;;  %v845_v59 = vsel %vm833_vm3, %v5166_v50, %v5170_v15  ;;  %v747_v47 = vsel %vm87_vm0, %v5172_v16, %v5171_v3  ;;  %v5175_v57 = vld [vmem:[#allocation89_spill] sm:$0xff]  ;;  %v5178_v16 = vld [vmem:[#allocation78_spill] sm:$0xff] }
 0x28b   :  { %5168 = vst [vmem:[#allocation18_spill] sm:$0xff] %v4115_v17  ;;  %v4131_v25 = vsel %vm480_vm1, %v5162_v21, %v5173_v60  ;;  %v587_v20 = vmul.f32 %v5174_v19, %v523_v2  ;;  %v748_v30 = vsel %vm87_vm0, %v5171_v3, %v5175_v57  ;;  %v1035_v28 = vsel %vm3587_vm2, %v1003_v49, 0.0  ;;  %v5177_v2 = vld [vmem:[#allocation130_spill] sm:$0xff] }
 0x28c   :  { %5169 = vst [vmem:[#allocation13_spill] sm:$0xff] %v4118_v37  ;;  %2045 = vperm.xlu1 %2349, %v2041_v63   ;;  %v4137_v1 = vpop.permute.xlu1 %1506  ;;  %v876_v60 = vsel %vm3609_vm4, %v844_v14, 0.0  ;;  %v588_v21 = vmul.f32 %v5174_v19, %v524_v42  ;;  %v2305_v50 = vunpack.i.h.bf16 %v5177_v2  ;;  %v843_v3 = vsel %vm833_vm3, %v5160_v29, %v5178_v16  ;;  %v5179_v63 = vld [vmem:[#allocation84_spill] sm:$0xff]  ;;  %v5182_v14 = vld [vmem:[#allocation22_spill] sm:$0xff]  ;;  %v5183_v19 = vld [vmem:[#allocation79_spill] sm:$0xff] }
 0x28d   :  { %5176 = vst [vmem:[#allocation46_spill] sm:$0xff] %v4137_v1  ;;  %v5180_v57 = vunpack.i.h.bf16 %v5103_v18  ;;  %v877_v15 = vsel %vm3741_vm10, %v845_v59, 0.0  ;;  %v779_v49 = vadd.f32 %v747_v47, %v587_v20  ;;  %v4160_v45 = vmul.f32 %v5182_v14, %v874_v27  ;;  %v5185_v16 = vld [vmem:[#allocation27_spill] sm:$0xff]  ;;  %v5191_v47 = vld [vmem:[#allocation37_spill] sm:$0xff] }
 0x28e   :  { %v4157_v53 = vpop.permute.xlu0 %1639  ;;  %v1004_v42 = vsel %vm994_vm5, %v5164_v62, %v5183_v19  ;;  %v1006_v29 = vsel %vm994_vm5, %v5179_v63, %v5184_v33  ;;  %v780_v18 = vadd.f32 %v748_v30, %v588_v21  ;;  %v5186_v37 = vld [vmem:[#allocation15_spill] sm:$0xff]  ;;  %v1162_v27 = vadd.f32 %v3891_v51, %v1098_v44  ;;  %v5188_v19 = vld [vmem:[#allocation114_spill] sm:$0xff] }
 0x28f   :  { %v1005_v1 = vsel %vm994_vm5, %v5180_v57, %v5179_v63  ;;  %5181 = vst [vmem:[#allocation14_spill] sm:$0xff] %v4157_v53  ;;  %v4169_v57 = vmul.f32 %v5185_v16, %v1035_v28  ;;  %v924_v59 = vmul.f32 %v5186_v37, %v876_v60  ;;  %v875_v20 = vsel %vm3741_vm10, %v843_v3, 0.0 }
 0x290   :  { %v1037_v62 = vsel %vm3587_vm2, %v1005_v1, 0.0  ;;  %v925_v33 = vmul.f32 %v5186_v37, %v877_v15  ;;  %v1275_v30 = vsel %vm1267_vm7, %v3494_v32, %v2305_v50  ;;  %v1036_v60 = vsel %vm3704_vm8, %v1004_v42, 0.0  ;;  %v5190_v50 = vld [vmem:[#allocation35_spill] sm:$0xff] }
 0x291   :  { %v4183_v28 = vpop.permute.xlu1 %1832  ;;  %v1038_v21 = vsel %vm3704_vm8, %v1006_v29, 0.0  ;;  %v940_v51 = vadd.f32 %v924_v59, %v779_v49  ;;  %v2298_v44 = vunpack.i.l.bf16 %v3556_v7  ;;  %v2290_v1 = vunpack.i.l.bf16 %v5188_v19  ;;  %v5192_v29 = vld [vmem:[#allocation107_spill] sm:$0xff]  ;;  %v5195_v19 = vld [vmem:[#allocation117_spill] sm:$0xff] }
 0x292   :  { %5187 = vst [vmem:[#allocation48_spill] sm:$0xff] %v4183_v28  ;;  %v1262_v3 = vpop.permute.xlu0 %1261  ;;  %v941_v63 = vadd.f32 %v925_v33, %v780_v18  ;;  %v2304_v37 = vunpack.i.l.bf16 %v5177_v2  ;;  %v4197_v15 = vmul.f32 %v5182_v14, %v875_v20  ;;  %v1085_v42 = vmul.f32 %v5190_v50, %v1037_v62  ;;  %v5193_v59 = vld [vmem:[#allocation39_spill] sm:$0xff]  ;;  %v5204_v28 = vld [vmem:[#allocation36_spill] sm:$0xff] }
 0x293   :  { %v4194_v32 = vsel %vm1267_vm7, %v1262_v3, %v4115_v17  ;;  %v1149_v49 = vmul.f32 %v5192_v29, %v5191_v47  ;;  %v1307_v7 = vsel %vm3741_vm10, %v1275_v30, 0.0  ;;  %v4205_v18 = vmul.f32 %v5185_v16, %v1036_v60  ;;  %v5194_v3 = vld [vmem:[#allocation104_spill] sm:$0xff]  ;;  %v5196_v62 = vld [vmem:[#allocation123_spill] sm:$0xff] }
 0x294   :  { %5189 = vst [vmem:[#allocation24_spill] sm:$0xff] %v4194_v32  ;;  %v1086_v2 = vmul.f32 %v5190_v50, %v1038_v21  ;;  %v1150_v33 = vmul.f32 %v5192_v29, %v5193_v59  ;;  %v1268_v14 = vsel %vm1267_vm7, %v5195_v19, %v5194_v3  ;;  %v1101_v20 = vadd.f32 %v1085_v42, %v940_v51  ;;  %v5197_v47 = vld [vmem:[#allocation127_spill] sm:$0xff]  ;;  %v5198_v17 = vld [vmem:[#allocation140_spill] sm:$0xff]  ;;  %v5201_v51 = vld [vmem:[#allocation113_spill] sm:$0xff] }
 0x295   :  { %v1430_v32 = vsel %vm1428_vm6, %v5196_v62, %v2298_v44  ;;  %v1429_v30 = vsel %vm1428_vm6, %v5197_v47, %v5196_v62  ;;  %v1468_v16 = vsel %vm3704_vm8, %v5198_v17, 0.0  ;;  %v1269_v29 = vsel %vm1267_vm7, %v5194_v3, %v2290_v1  ;;  %v5202_v44 = vld [vmem:[#allocation112_spill] sm:$0xff]  ;;  %v5203_v19 = vld [vmem:[#allocation81_spill] sm:$0xff]  ;;  %v5207_v3 = vld [vmem:[#allocation30_spill] sm:$0xff] }
 0x296   :  { %v4221_v60 = vpop.permute.xlu1 %1899  ;;  %v4223_v21 = vpop.permute.xlu0 %1844  ;;  %v1102_v50 = vadd.f32 %v1086_v2, %v941_v63  ;;  %v1273_v42 = vsel %vm1267_vm7, %v5201_v51, %v2304_v37  ;;  %v1355_v59 = vmul.f32 %v5202_v44, %v1307_v7  ;;  %v4233_v62 = vsel %vm87_vm0, %v5204_v28, %v5203_v19  ;;  %v5205_v47 = vld [vmem:[#allocation80_spill] sm:$0xff]  ;;  %v5206_v28 = vld [vmem:[#allocation121_spill] sm:$0xff]  ;;  %v5208_v44 = vld [vmem:[#allocation115_spill] sm:$0xff] }
 0x297   :  { %5199 = vst [vmem:[#allocation52_spill] sm:$0xff] %v4221_v60  ;;  %5200 = vst [vmem:[#allocation53_spill] sm:$0xff] %v4223_v21  ;;  %v4238_v17 = vsel %vm87_vm0, %v5203_v19, %v5205_v47  ;;  %v4240_v21 = vadd.f32 %v1149_v49, %v1101_v20  ;;  %v1300_v63 = vsel %vm3609_vm4, %v1268_v14, 0.0  ;;  %v1462_v37 = vsel %vm3704_vm8, %v1430_v32, 0.0 }
 0x298   :  { %v4244_v1 = vadd.f32 %v1150_v33, %v1102_v50  ;;  %v1461_v7 = vsel %vm3587_vm2, %v1429_v30, 0.0  ;;  %v1516_v2 = vmul.f32 %v5206_v28, %v1468_v16  ;;  %v4253_v53 = vmul.f32 %v5208_v44, %v5207_v3  ;;  %v5209_v33 = vld [vmem:[#allocation142_spill] sm:$0xff]  ;;  %v5211_v50 = vld [vmem:[#allocation33_spill] sm:$0xff]  ;;  %v5213_v3 = vld [vmem:[#allocation108_spill] sm:$0xff] }
 0x299   :  { %v1301_v49 = vsel %vm3741_vm10, %v1269_v29, 0.0  ;;  %v1305_v14 = vsel %vm3741_vm10, %v1273_v42, 0.0  ;;  %v1800_v20 = vsel %vm3741_vm10, %v5209_v33, 0.0  ;;  %v4266_v30 = vmul.f32 %v5208_v44, %v5211_v50  ;;  %v5212_v16 = vld [vmem:[#allocation118_spill] sm:$0xff] }
 0x29a   :  { %v4262_v32 = vpop.permute.xlu1 %1904  ;;  %v4269_v19 = vmul.f32 %v5212_v16, %v1300_v63  ;;  %v1349_v47 = vmul.f32 %v5212_v16, %v1301_v49  ;;  %v1371_v29 = vadd.f32 %v1355_v59, %v1162_v27  ;;  %v4273_v60 = vmul.f32 %v5213_v3, %v1462_v37  ;;  %v5216_v49 = vld [vmem:[#allocation133_spill] sm:$0xff]  ;;  %v5217_v59 = vld [vmem:[#allocation122_spill] sm:$0xff] }
 0x29b   :  { %5210 = vst [vmem:[#allocation55_spill] sm:$0xff] %v4262_v32  ;;  %v540_v28 = vpop.permute.xlu0 %539  ;;  %v4276_v42 = vmul.f32 %v5213_v3, %v1461_v7  ;;  %v5214_v33 = vsel %vm3587_vm2, %v3884_v10, 0.0  ;;  %v5215_v63 = vsel %vm3704_vm8, %v3918_v31, 0.0  ;;  %v4289_v27 = vsel %vm1267_vm7, %v5216_v49, %v5201_v51  ;;  %v5218_v7 = vld [vmem:[#allocation110_spill] sm:$0xff]  ;;  %v5219_v10 = vld [vmem:[#allocation137_spill] sm:$0xff]  ;;  %v5220_v31 = vld [vmem:[#allocation132_spill] sm:$0xff] }
 0x29c   :  { %v577_v32 = vmul.f32 %v540_v28, %v5214_v33  ;;  %v578_v44 = vmul.f32 %v540_v28, %v5215_v63  ;;  %v4292_v37 = vmul.f32 %v5217_v59, %v1800_v20  ;;  %v4295_v50 = vmul.f32 %v5218_v7, %v1305_v14  ;;  %v5221_v14 = vld [vmem:[#allocation141_spill] sm:$0xff] }
 0x29d   :  { %v4297_v16 = vadd.f32 %v1516_v2, %v1371_v29  ;;  %v4302_v3 = vsel %vm1669_vm11, %v5219_v10, %v3829_v13  ;;  %v4307_v28 = vsel %vm1669_vm11, %v3829_v13, %v5220_v31  ;;  %v1469_v2 = vsel %vm3587_vm2, %v3900_v23, 0.0 }
 0x29e   :  { %v769_v51 = vadd.f32 %v3972_v24, %v577_v32  ;;  %v770_v20 = vadd.f32 %v4028_v41, %v578_v44  ;;  %v2334_v33 = vpop.permute.xlu1 %2333  ;;  %v1767_v29 = vsel %vm1766_vm9, %v3911_v36, %v5221_v14  ;;  %v5222_v24 = vsel %vm3704_vm8, %v4019_v22, 0.0 }
 0x29f   :  { %v2336_v63 = vunpack.i.h.bf16 %v2334_v33  ;;  %v2335_v49 = vunpack.i.l.bf16 %v2334_v33  ;;  %v550_v10 = vpop.permute.xlu0 %549  ;;  %v1946_v32 = vsub.f32 0.0, %v3934_v4  ;;  %v2341_v23 = vunpack.i.h.bf16 %v3853_v40 }
 0x2a0   :  { %v930_v7 = vadd.f32 %v3945_v52, %v769_v51  ;;  %v931_v13 = vadd.f32 %v3967_v56, %v770_v20  ;;  %v582_v41 = vmul.f32 %v550_v10, %v5222_v24  ;;  %v1311_v36 = vsel %vm3741_vm10, %v4012_v61, 0.0  ;;  %v5223_v20 = vld [vmem:[#allocation129_spill] sm:$0xff] }
 0x2a1   :  { %v4330_v44 = vsel %vm1428_vm6, %v3788_v54, %v2335_v49  ;;  %v4334_v52 = vsel %vm1428_vm6, %v3814_v8, %v2336_v63  ;;  %v1799_v56 = vsel %vm3609_vm4, %v1767_v29, 0.0  ;;  %v1310_v22 = vsel %vm3609_vm4, %v4100_v9, 0.0  ;;  %v5224_v9 = vld [vmem:[#allocation120_spill] sm:$0xff] }
 0x2a2   :  { %v1091_v31 = vadd.f32 %v3948_v34, %v930_v7  ;;  %v1092_v51 = vadd.f32 %v3955_v55, %v931_v13  ;;  %v4343_v61 = vpop.permute.xlu1 %1732  ;;  %v2340_v54 = vunpack.i.l.bf16 %v3853_v40  ;;  %v4347_v33 = vmul.f32 %v5223_v20, %v1469_v2 }
 0x2a3   :  { %v1308_v14 = vsel %vm3609_vm4, %v3961_v6, 0.0  ;;  %v774_v29 = vadd.f32 %v4081_v0, %v582_v41  ;;  %v560_v63 = vpop.permute.xlu0 %559  ;;  %v1309_v34 = vsel %vm3741_vm10, %v3964_v43, 0.0  ;;  %v1359_v55 = vmul.f32 %v5224_v9, %v1311_v36 }
 0x2a4   :  { %v1156_v7 = vadd.f32 %v3861_v38, %v1092_v51  ;;  %v1965_v49 = vmul.f32 1.442695, %v1946_v32  ;;  %v4359_v40 = vmul.f32 %v5217_v59, %v1799_v56  ;;  %v1358_v2 = vmul.f32 %v5224_v9, %v1310_v22  ;;  %v5228_v56 = vld [vmem:[#allocation125_spill] sm:$0xff] }
 0x2a5   :  { %v5225_v6 = vsel %vm3587_vm2, %v3987_v39, 0.0  ;;  %v935_v13 = vadd.f32 %v4068_v35, %v774_v29  ;;  %v1155_v24 = vadd.f32 %v3857_v58, %v1091_v31  ;;  %v5226_v38 = vsel %vm3587_vm2, %v4095_v46, 0.0  ;;  %v5230_v29 = vld [vmem:[#allocation38_spill] sm:$0xff] }
 0x2a6   :  { %v581_v0 = vmul.f32 %v550_v10, %v5225_v6  ;;  %v1365_v43 = vadd.f32 %v1349_v47, %v1156_v7  ;;  %v585_v41 = vmul.f32 %v560_v63, %v5226_v38  ;;  %v5227_v59 = vsel %vm3704_vm8, %v4131_v25, 0.0  ;;  %v4376_v36 = vpop.permute.xlu1 %1738  ;;  %v5229_v47 = vld [vmem:[#allocation13_spill] sm:$0xff] }
 0x2a7   :  { %v586_v32 = vmul.f32 %v560_v63, %v5227_v59  ;;  %v1356_v39 = vmul.f32 %v5228_v56, %v1308_v14  ;;  %v1357_v10 = vmul.f32 %v5228_v56, %v1309_v34  ;;  %v1096_v35 = vadd.f32 %v4065_v48, %v935_v13  ;;  %v4381_v58 = vpop.permute.xlu0 %569  ;;  %v5231_v34 = vld [vmem:[#allocation111_spill] sm:$0xff]  ;;  %v5235_v59 = vld [vmem:[#allocation136_spill] sm:$0xff]  ;;  %v5236_v56 = vld [vmem:[#allocation26_spill] sm:$0xff] }
 0x2a8   :  { %v1945_v22 = vsub.f32 0.0, %v5229_v47  ;;  %v1375_v46 = vadd.f32 %v1359_v55, %v4244_v1  ;;  %v777_v31 = vadd.f32 %v4233_v62, %v585_v41  ;;  %2429 = vpow2.f32 %v1965_v49 }
 0x2a9   :  { %v778_v51 = vadd.f32 %v4238_v17, %v586_v32  ;;  %v1374_v25 = vadd.f32 %v1358_v2, %v4240_v21  ;;  %v773_v63 = vadd.f32 %v5230_v29, %v581_v0  ;;  %v1772_v14 = vsel %vm1766_vm9, %v4343_v61, %v2340_v54  ;;  %v5233_v0 = vld [vmem:[#allocation134_spill] sm:$0xff] }
 0x2aa   :  { %v1160_v48 = vadd.f32 %v5231_v34, %v1096_v35  ;;  %v1364_v9 = vadd.f32 %v4269_v19, %v1155_v24  ;;  %v938_v7 = vadd.f32 %v4160_v45, %v777_v31  ;;  %v1411_v55 = vpop.permute.xlu1 %1410  ;;  %v1526_v62 = vadd.f32 %v4273_v60, %v1365_v43  ;;  %v5234_v43 = vld [vmem:[#allocation143_spill] sm:$0xff] }
 0x2ab   :  { %v939_v1 = vadd.f32 %v4197_v15, %v778_v51  ;;  %v1470_v21 = vsel %vm3704_vm8, %v4330_v44, 0.0  ;;  %v1439_v17 = vsel %vm1428_vm6, %v1411_v55, %v3814_v8  ;;  %v4401_v49 = vpop.permute.xlu0 %1914  ;;  %v1963_v2 = vmul.f32 1.442695, %v1945_v22  ;;  %v5232_v8 = vld [vmem:[#allocation106_spill] sm:$0xff] }
 0x2ac   :  { %v1369_v54 = vadd.f32 %v4295_v50, %v1160_v48  ;;  %v1804_v45 = vsel %vm3741_vm10, %v1772_v14, 0.0  ;;  %v1099_v15 = vadd.f32 %v4169_v57, %v938_v7  ;;  %v1471_v60 = vsel %vm3587_vm2, %v1439_v17, 0.0  ;;  %v5237_v48 = vld [vmem:[#allocation28_spill] sm:$0xff] }
 0x2ad   :  { %v1100_v19 = vadd.f32 %v4205_v18, %v939_v1  ;;  %v1472_v44 = vsel %vm3704_vm8, %v4334_v52, 0.0  ;;  %v934_v6 = vadd.f32 %v5232_v8, %v773_v63  ;;  %v1774_v50 = vsel %vm1766_vm9, %v4376_v36, %v2341_v23  ;;  %v5238_v1 = vld [vmem:[#allocation138_spill] sm:$0xff]  ;;  %v5241_v17 = vld [vmem:[#allocation52_spill] sm:$0xff] }
 0x2ae   :  { %v1519_v13 = vmul.f32 %v5233_v0, %v1471_v60  ;;  %v1638_v24 = vpop.permute.xlu1 %1637  ;;  %v1530_v38 = vadd.f32 %v5234_v43, %v1369_v54  ;;  %v1163_v57 = vadd.f32 %v4253_v53, %v1099_v15  ;;  %v1703_v18 = vadd.f32 %v4307_v28, %v1526_v62  ;;  %v5240_v62 = vld [vmem:[#allocation144_spill] sm:$0xff] }
 0x2af   :  { %v1525_v41 = vadd.f32 %v4276_v42, %v1364_v9  ;;  %v1852_v32 = vmul.f32 %v5235_v59, %v1804_v45  ;;  %v1675_v52 = vsel %vm1669_vm11, %v5236_v56, %v1638_v24  ;;  %v4424_v35 = vpop.permute.xlu0 %1424  ;;  %v1164_v23 = vadd.f32 %v4266_v30, %v1100_v19 }
 0x2b0   :  { %v1518_v22 = vmul.f32 %v5223_v20, %v1470_v21  ;;  %v1806_v31 = vsel %vm3741_vm10, %v1774_v50, 0.0  ;;  %v1707_v51 = vadd.f32 %v1675_v52, %v1530_v38  ;;  %v1372_v53 = vadd.f32 %v1356_v39, %v1163_v57  ;;  %v5239_v39 = vld [vmem:[#allocation20_spill] sm:$0xff]  ;;  %v5245_v38 = vld [vmem:[#allocation55_spill] sm:$0xff] }
 0x2b1   :  { %v1864_v28 = vadd.f32 %v4292_v37, %v1703_v18  ;;  %v1702_v42 = vadd.f32 %v4302_v3, %v1525_v41  ;;  %v1373_v29 = vadd.f32 %v1357_v10, %v1164_v23  ;;  %v1520_v63 = vmul.f32 %v5233_v0, %v1472_v44  ;;  %v5246_v41 = vld [vmem:[#allocation135_spill] sm:$0xff] }
 0x2b2   :  { %v4433_v14 = vadd.f32 %v1519_v13, %v1374_v25  ;;  %v2430_v34 = vpop.eup %2429  ;;  %v1095_v9 = vadd.f32 %v5237_v48, %v934_v6  ;;  %v1868_v30 = vadd.f32 %v1852_v32, %v1707_v51  ;;  %v1644_v7 = vpop.permute.xlu1 %1643  ;;  %v4437_v20 = vadd.f32 %v4347_v33, %v1372_v53  ;;  %v5244_v13 = vld [vmem:[#allocation110_spill] sm:$0xff] }
 0x2b3   :  { %v4440_v55 = vadd.f32 %v5238_v1, %v1864_v28  ;;  %v1677_v37 = vsel %vm1669_vm11, %v5239_v39, %v1644_v7  ;;  %v1863_v3 = vadd.f32 %v4359_v40, %v1702_v42  ;;  %v4445_v10 = vadd.f32 %v1518_v22, %v1373_v29  ;;  %v4457_v15 = vpop.permute.xlu0 %2356 }
 0x2b4   :  { %v4447_v25 = vadd.f32 %v1520_v63, %v1375_v46  ;;  %v1854_v21 = vmul.f32 %v5240_v62, %v1806_v31  ;;  %v4451_v54 = vadd.f32 %v5241_v17, %v1868_v30  ;;  %v1709_v33 = vadd.f32 %v1677_v37, %v4297_v16  ;;  %v5242_v46 = vld [vmem:[#allocation14_spill] sm:$0xff]  ;;  %v5248_v30 = vld [vmem:[#allocation16_spill] sm:$0xff] }
 0x2b5   :  { %2431 = vpow2.f32 %v1963_v2  ;;  %v1304_v45 = vsel %vm3609_vm4, %v4289_v27, 0.0  ;;  %v1944_v40 = vsub.f32 0.0, %v4440_v55  ;;  %v4461_v19 = vadd.f32 %v5238_v1, %v1863_v3  ;;  %v5243_v2 = vld [vmem:[#allocation10_spill] sm:$0xff] }
 0x2b6   :  { %v1676_v60 = vsel %vm1669_vm11, %v5242_v46, %v5239_v39  ;;  %v1948_v44 = vsub.f32 0.0, %v4451_v54  ;;  %v1870_v8 = vadd.f32 %v1854_v21, %v1709_v33  ;;  %v1737_v16 = vpop.permute.xlu1 %1736  ;;  %v1159_v6 = vadd.f32 %v5243_v2, %v1095_v9 }
 0x2b7   :  { %v1773_v27 = vsel %vm1766_vm9, %v1737_v16, %v4376_v36  ;;  %v1961_v50 = vmul.f32 1.442695, %v1944_v40  ;;  %v1943_v0 = vsub.f32 0.0, %v4461_v19  ;;  %v1352_v24 = vmul.f32 %v5244_v13, %v1304_v45  ;;  %v5247_v36 = vld [vmem:[#allocation50_spill] sm:$0xff]  ;;  %v4485_v42 = vpop.permute.xlu0 %1416 }
 0x2b8   :  { %v1969_v43 = vmul.f32 1.442695, %v1948_v44  ;;  %v4473_v57 = vadd.f32 %v5245_v38, %v1870_v8  ;;  %v1805_v18 = vsel %vm3609_vm4, %v1773_v27, 0.0  ;;  %v1708_v32 = vadd.f32 %v1676_v60, %v5246_v41 }
 0x2b9   :  { %v1853_v52 = vmul.f32 %v5240_v62, %v1805_v18  ;;  %2433 = vpow2.f32 %v1961_v50  ;;  %v1959_v23 = vmul.f32 1.442695, %v1943_v0  ;;  %v1771_v22 = vsel %vm1766_vm9, %v5247_v36, %v4343_v61 }
 0x2ba   :  { %2435 = vpow2.f32 %v1969_v43  ;;  %v1950_v31 = vsub.f32 0.0, %v4473_v57  ;;  %v4483_v51 = vpop.permute.xlu1 %2343  ;;  %v1368_v53 = vadd.f32 %v1352_v24, %v1159_v6  ;;  %v1803_v63 = vsel %vm3609_vm4, %v1771_v22, 0.0 }
 0x2bb   :  { %v1869_v28 = vadd.f32 %v1853_v52, %v1708_v32  ;;  %2437 = vpow2.f32 %v1959_v23  ;;  %v1994_v37 = vadd.f32 1.0, %v2430_v34  ;;  %v1851_v3 = vmul.f32 %v5235_v59, %v1803_v63  ;;  %v4497_v33 = vpop.permute.xlu0 %1647 }
 0x2bc   :  { %v1973_v29 = vmul.f32 1.442695, %v1950_v31  ;;  %v1529_v7 = vadd.f32 %v5248_v30, %v1368_v53 }
 0x2bd   :  { %v4490_v48 = vadd.f32 %v5245_v38, %v1869_v28 }
 0x2be   :  { %2439 = vpow2.f32 %v1973_v29  ;;  %v1634_v61 = vpop.permute.xlu1 %1633 }
 0x2bf   :  { %v2432_v9 = vpop.eup %2431  ;;  %v1949_v1 = vsub.f32 0.0, %v4490_v48  ;;  %v1674_v39 = vsel %vm1669_vm11, %v1634_v61, %v5236_v56  ;;  %2441 = vrcp.f32 %v1994_v37  ;;  %v4507_v27 = vpop.permute.xlu0 %1653 }
 0x2c0   :  { %v1706_v62 = vadd.f32 %v1674_v39, %v1529_v7  ;;  %v1993_v45 = vadd.f32 1.0, %v2432_v9  ;;  %v5249_v7 = vld [vmem:[#allocation19_spill] sm:$0xff] }
 0x2c1   :  { %v1971_v21 = vmul.f32 1.442695, %v1949_v1  ;;  %v2253_v1 = vunpack.i.l.bf16 %v5249_v7 }
 0x2c2   :  { %v1867_v40 = vadd.f32 %v1851_v3, %v1706_v62  ;;  %v4499_v46 = vpop.permute.xlu1 %1255  ;;  %v5250_v3 = vld [vmem:[#allocation6_spill] sm:$0xff] }
 0x2c3   :  { %v2434_v60 = vpop.eup %2433  ;;  %2443 = vpow2.f32 %v1971_v21  ;;  %v1743_v43 = vpop.permute.xlu0 %1742  ;;  %v2231_v62 = vunpack.i.l.bf16 %v5250_v3  ;;  %v5251_v21 = vld [vmem:[#allocation21_spill] sm:$0xff] }
 0x2c4   :  { %v2436_v44 = vpop.eup %2435  ;;  %v4502_v8 = vadd.f32 %v5241_v17, %v1867_v40  ;;  %v1992_v16 = vadd.f32 1.0, %v2434_v60  ;;  %2445 = vrcp.f32 %v1993_v45  ;;  %v5252_v45 = vld [vmem:[#allocation90_spill] sm:$0xff]  ;;  %v2254_v60 = vunpack.i.h.bf16 %v5249_v7 }
 0x2c5   :  { %v2438_v56 = vpop.eup %2437  ;;  %v1996_v34 = vadd.f32 1.0, %v2436_v44  ;;  %v2358_v7 = vunpack.i.l.bf16 %v4457_v15 }
 0x2c6   :  { %v1947_v59 = vsub.f32 0.0, %v4502_v8  ;;  %v4505_v2 = vpop.permute.xlu1 %1840  ;;  %2447 = vrcp.f32 %v1992_v16  ;;  %v1991_v6 = vadd.f32 1.0, %v2438_v56  ;;  %v2232_v16 = vunpack.i.h.bf16 %v5250_v3  ;;  %v5253_v56 = vld [vmem:[#allocation91_spill] sm:$0xff] }
 0x2c7   :  { %v1646_v53 = vpop.permute.xlu0 %1645 }
 0x2c8   :  { %v2440_v50 = vpop.eup %2439  ;;  %v1967_v0 = vmul.f32 1.442695, %v1947_v59  ;;  %2449 = vrcp.f32 %v1991_v6 }
 0x2c9   :  { %2451 = vrcp.f32 %v1996_v34  ;;  %v1998_v13 = vadd.f32 1.0, %v2440_v50  ;;  %v2442_v24 = vpop.eup %2441  ;;  %v5255_v50 = vld [vmem:[#allocation99_spill] sm:$0xff] }
 0x2ca   :  { %2453 = vpow2.f32 %v1967_v0  ;;  %v2026_v36 = vmul.f32 %v2442_v24, %v3934_v4  ;;  %v848_v0 = vsel %vm833_vm3, %v2254_v60, %v5255_v50 }
 0x2cb   :  { %2455 = vrcp.f32 %v1998_v13  ;;  %v4509_v17 = vpop.permute.xlu1 %1909  ;;  %v4534_v59 = vpop.permute.xlu0 %1919  ;;  %v5256_v13 = vld [vmem:[#allocation93_spill] sm:$0xff] }
 0x2cc   :  { %v494_v24 = vsel %vm480_vm1, %v5253_v56, %v5256_v13 }
 0x2cd   :  { %v2444_v38 = vpop.eup %2443 }
 0x2ce   :  { %v2446_v18 = vpop.eup %2445  ;;  %v1997_v52 = vadd.f32 1.0, %v2444_v38  ;;  %v5257_v38 = vld [vmem:[#allocation98_spill] sm:$0xff] }
 0x2cf   :  { %v4511_v41 = vpop.permute.xlu1 %1418  ;;  %v2025_v63 = vmul.f32 %v2446_v18, %v5229_v47  ;;  %v846_v47 = vsel %vm833_vm3, %v2253_v1, %v5252_v45  ;;  %v495_v18 = vsel %vm480_vm1, %v2232_v16, %v5257_v38  ;;  %v4585_v60 = vpop.permute.xlu0 %1756 }
 0x2d0   :  { %v2448_v32 = vpop.eup %2447  ;;  %2457 = vrcp.f32 %v1997_v52  ;;  %v878_v6 = vsel %vm3609_vm4, %v846_v47, 0.0  ;;  %v527_v1 = vsel %vm3587_vm2, %v495_v18, 0.0  ;;  %v5267_v18 = vld [vmem:[#allocation9_spill] sm:$0xff] }
 0x2d1   :  { %v2024_v23 = vmul.f32 %v2448_v32, %v4440_v55 }
 0x2d2   :  { %v2450_v22 = vpop.eup %2449 }
 0x2d3   :  { %v2452_v31 = vpop.eup %2451  ;;  %v2175_v28 = vpack.c.bf16 %v2026_v36, %v2024_v23  ;;  %v2023_v29 = vmul.f32 %v2450_v22, %v4461_v19  ;;  %v4517_v9 = vpop.permute.xlu1 %2351  ;;  %v2275_v19 = vunpack.i.l.bf16 %v5251_v21  ;;  %v2276_v23 = vunpack.i.h.bf16 %v5251_v21  ;;  %v5258_v22 = vld [vmem:[#allocation95_spill] sm:$0xff] }
 0x2d4   :  { %v2454_v61 = vpop.eup %2453  ;;  %v2028_v4 = vmul.f32 %v2452_v31, %v4451_v54  ;;  %v4530_v54 = vsel %vm480_vm1, %v2231_v62, %v5253_v56  ;;  %v5262_v62 = vld [vmem:[#allocation45_spill] sm:$0xff] }
 0x2d5   :  { %v2456_v30 = vpop.eup %2455  ;;  %v1995_v39 = vadd.f32 1.0, %v2454_v61  ;;  %2176 = vmatprep.subr.bf16.mxu1 %v2175_v28  ;;  %v2177_v55 = vpack.c.bf16 %v2025_v63, %v2023_v29  ;;  %v525_v28 = vsel %vm3587_vm2, %v4530_v54, 0.0  ;;  %v5259_v29 = vld [vmem:[#allocation23_spill] sm:$0xff] }
 0x2d6   :  { %v2030_v37 = vmul.f32 %v2456_v30, %v4473_v57  ;;  %v5254_v57 = vld [vmem:[#allocation92_spill] sm:$0xff]  ;;  %v4560_v63 = vmul.f32 %v5259_v29, %v878_v6  ;;  %v880_v30 = vsel %vm3609_vm4, %v848_v0, 0.0  ;;  %v5265_v6 = vld [vmem:[#allocation105_spill] sm:$0xff]  ;;  %v5266_v0 = vld [vmem:[#allocation47_spill] sm:$0xff] }
 0x2d7   :  { %2459 = vrcp.f32 %v1995_v39  ;;  %2178 = vmatpush1.bf16.msra.mxu1 %v2177_v55  ;;  %v1745_v40 = vpop.permute.xlu1 %1744  ;;  %v1007_v34 = vsel %vm994_vm5, %v2275_v19, %v5254_v57  ;;  %v4554_v31 = vsel %vm994_vm5, %v5254_v57, %v5258_v22  ;;  %v5261_v39 = vld [vmem:[#allocation101_spill] sm:$0xff]  ;;  %v751_v13 = vsel %vm87_vm0, %v5266_v0, %v5265_v6  ;;  %v4624_v0 = vpop.permute.xlu0 %1762 }
 0x2d8   :  { %v2179_v44 = vpack.c.bf16 %v2030_v37, %v2028_v4  ;;  %v1775_v32 = vsel %vm1766_vm9, %v1743_v43, %v1745_v40  ;;  %v1039_v36 = vsel %vm3587_vm2, %v1007_v34, 0.0  ;;  %v5260_v43 = vld [vmem:[#allocation94_spill] sm:$0xff]  ;;  %v496_v55 = vsel %vm480_vm1, %v5257_v38, %v5261_v39  ;;  %v5264_v57 = vld [vmem:[#allocation17_spill] sm:$0xff] }
 0x2d9   :  { %v847_v61 = vsel %vm833_vm3, %v5252_v45, %v5260_v43  ;;  %v526_v4 = vsel %vm3704_vm8, %v494_v24, 0.0  ;;  %v1807_v37 = vsel %vm3609_vm4, %v1775_v32, 0.0  ;;  %v4578_v21 = vmul.f32 %v5262_v62, %v1039_v36  ;;  %v5263_v45 = vld [vmem:[#allocation100_spill] sm:$0xff] }
 0x2da   :  { %2180 = vmatprep.subr.bf16.mxu1 %v2179_v44  ;;  %v2458_v3 = vpop.eup %2457  ;;  %v1040_v19 = vsel %vm3704_vm8, %v4554_v31, 0.0  ;;  %v1009_v47 = vsel %vm994_vm5, %v2276_v23, %v5263_v45  ;;  %v1776_v44 = vsel %vm1766_vm9, %v1745_v40, %v2358_v7  ;;  %v879_v56 = vsel %vm3741_vm10, %v847_v61, 0.0  ;;  %v5268_v36 = vld [vmem:[#allocation48_spill] sm:$0xff] }
 0x2db   :  { %v4546_v52 = vpop.permute.xlu1 %1750  ;;  %v928_v34 = vmul.f32 %v5264_v57, %v880_v30  ;;  %v1678_v24 = vsel %vm1669_vm11, %v1646_v53, %v4497_v33  ;;  %v591_v32 = vmul.f32 %v5267_v18, %v527_v1  ;;  %v528_v40 = vsel %vm3704_vm8, %v496_v55, 0.0  ;;  %v5269_v30 = vld [vmem:[#allocation103_spill] sm:$0xff] }
 0x2dc   :  { %v2359_v23 = vunpack.i.h.bf16 %v4457_v15  ;;  %v1855_v22 = vmul.f32 %v5268_v36, %v1807_v37  ;;  %v1041_v31 = vsel %vm3587_vm2, %v1009_v47, 0.0  ;;  %v1808_v43 = vsel %vm3741_vm10, %v1776_v44, 0.0  ;;  %v5270_v37 = vld [vmem:[#allocation102_spill] sm:$0xff] }
 0x2dd   :  { %v2029_v53 = vmul.f32 %v2458_v3, %v4490_v48  ;;  %v1010_v7 = vsel %vm994_vm5, %v5263_v45, %v5269_v30  ;;  %v783_v1 = vadd.f32 %v751_v13, %v591_v32  ;;  %v1710_v39 = vadd.f32 %v1678_v24, %v4437_v20  ;;  %v5271_v3 = vld [vmem:[#allocation109_spill] sm:$0xff]  ;;  %v5273_v32 = vld [vmem:[#allocation96_spill] sm:$0xff] }
 0x2de   :  { %v1778_v15 = vsel %vm1766_vm9, %v4546_v52, %v2359_v23  ;;  %v849_v47 = vsel %vm833_vm3, %v5255_v50, %v5270_v37  ;;  %v590_v44 = vmul.f32 %v4381_v58, %v526_v4  ;;  %v752_v45 = vsel %vm87_vm0, %v5265_v6, %v5271_v3  ;;  %v5274_v23 = vld [vmem:[#allocation42_spill] sm:$0xff]  ;;  %v5276_v37 = vld [vmem:[#allocation40_spill] sm:$0xff]  ;;  %v4657_v3 = vpop.permute.xlu0 %1661 }
 0x2df   :  { %v4588_v16 = vpop.permute.xlu1 %1422  ;;  %v1856_v20 = vmul.f32 %v5268_v36, %v1808_v43  ;;  %v1871_v13 = vadd.f32 %v1855_v22, %v1710_v39  ;;  %v592_v4 = vmul.f32 %v5267_v18, %v528_v40  ;;  %v1042_v6 = vsel %vm3704_vm8, %v1010_v7, 0.0 }
 0x2e0   :  { %v881_v36 = vsel %vm3741_vm10, %v849_v47, 0.0  ;;  %v944_v22 = vadd.f32 %v928_v34, %v783_v1  ;;  %v2345_v39 = vunpack.i.l.bf16 %v4483_v51  ;;  %v1088_v34 = vmul.f32 %v5262_v62, %v1040_v19  ;;  %v5277_v19 = vld [vmem:[#allocation126_spill] sm:$0xff] }
 0x2e1   :  { %v2460_v38 = vpop.eup %2459  ;;  %v4643_v40 = vadd.f32 %v4509_v17, %v1871_v13  ;;  %v927_v1 = vmul.f32 %v5259_v29, %v879_v56  ;;  %v749_v47 = vsel %vm87_vm0, %v5276_v37, %v5273_v32  ;;  %v2353_v62 = vunpack.i.l.bf16 %v4517_v9  ;;  %v5283_v37 = vld [vmem:[#allocation18_spill] sm:$0xff] }
 0x2e2   :  { %v2027_v61 = vmul.f32 %v2460_v38, %v4502_v8  ;;  %v5272_v38 = vld [vmem:[#allocation97_spill] sm:$0xff]  ;;  %v1281_v56 = vsel %vm1267_vm7, %v5277_v19, %v2345_v39 }
 0x2e3   :  { %v1650_v55 = vpop.permute.xlu1 %1649  ;;  %v750_v50 = vsel %vm87_vm0, %v5273_v32, %v5272_v38  ;;  %v5278_v32 = vld [vmem:[#allocation49_spill] sm:$0xff]  ;;  %v1313_v54 = vsel %vm3741_vm10, %v1281_v56, 0.0 }
 0x2e4   :  { %v1679_v48 = vsel %vm1669_vm11, %v4497_v33, %v1650_v55  ;;  %v2181_v8 = vpack.c.bf16 %v2029_v53, %v2027_v61  ;;  %v1089_v33 = vmul.f32 %v5274_v23, %v1041_v31  ;;  %v1810_v61 = vsel %vm3741_vm10, %v1778_v15, 0.0  ;;  %v5275_v31 = vld [vmem:[#allocation145_spill] sm:$0xff] }
 0x2e5   :  { %v1711_v24 = vadd.f32 %v1679_v48, %v4445_v10  ;;  %v784_v53 = vadd.f32 %v752_v45, %v592_v4  ;;  %v782_v30 = vadd.f32 %v750_v50, %v590_v44  ;;  %v1858_v15 = vmul.f32 %v5275_v31, %v1810_v61  ;;  %v5279_v50 = vld [vmem:[#allocation116_spill] sm:$0xff]  ;;  %v5280_v61 = vld [vmem:[#allocation51_spill] sm:$0xff] }
 0x2e6   :  { %2182 = vmatpush1.bf16.msra.mxu1 %v2181_v8  ;;  %v929_v44 = vmul.f32 %v5264_v57, %v881_v36  ;;  %v1090_v48 = vmul.f32 %v5274_v23, %v1042_v6  ;;  %v1105_v8 = vadd.f32 %v1089_v33, %v944_v22  ;;  %v1951_v57 = vsub.f32 0.0, %v4643_v40 }
 0x2e7   :  { %v1872_v10 = vadd.f32 %v1856_v20, %v1711_v24  ;;  %v1656_v43 = vpop.permute.xlu1 %1655  ;;  %v943_v13 = vadd.f32 %v927_v1, %v782_v30  ;;  %v1153_v4 = vmul.f32 %v5279_v50, %v5278_v32  ;;  %v589_v23 = vmul.f32 %v4381_v58, %v525_v28  ;;  %v5286_v32 = vld [vmem:[#allocation139_spill] sm:$0xff] }
 0x2e8   :  { %v1681_v18 = vsel %vm1669_vm11, %v4507_v27, %v1656_v43  ;;  %v1154_v6 = vmul.f32 %v5279_v50, %v5280_v61  ;;  %v2354_v36 = vunpack.i.h.bf16 %v4517_v9  ;;  %v1442_v58 = vsel %vm1428_vm6, %v4511_v41, %v2353_v62 }
 0x2e9   :  { %v4647_v7 = vadd.f32 %v4509_v17, %v1872_v10  ;;  %v1713_v55 = vadd.f32 %v1681_v18, %v4447_v25  ;;  %v945_v25 = vadd.f32 %v929_v44, %v784_v53  ;;  %v1104_v43 = vadd.f32 %v1088_v34, %v943_v13  ;;  %v4689_v53 = vpop.permute.xlu0 %1667 }
 0x2ea   :  { %v1975_v28 = vmul.f32 1.442695, %v1951_v57  ;;  %v781_v1 = vadd.f32 %v749_v47, %v589_v23  ;;  %v5285_v47 = vld [vmem:[#allocation124_spill] sm:$0xff]  ;;  %v1443_v62 = vsel %vm1428_vm6, %v4588_v16, %v4424_v35 }
 0x2eb   :  { %v1952_v17 = vsub.f32 0.0, %v4647_v7  ;;  %v1874_v45 = vadd.f32 %v1858_v15, %v1713_v55  ;;  %v1749_v20 = vpop.permute.xlu1 %1748  ;;  %v1106_v18 = vadd.f32 %v1090_v48, %v945_v25  ;;  %v5281_v15 = vld [vmem:[#allocation44_spill] sm:$0xff]  ;;  %v5282_v55 = vld [vmem:[#allocation131_spill] sm:$0xff]  ;;  %v1361_v13 = vmul.f32 %v5285_v47, %v1313_v54  ;;  %v5289_v54 = vld [vmem:[#allocation46_spill] sm:$0xff] }
 0x2ec   :  { %v1777_v29 = vsel %vm1766_vm9, %v1749_v20, %v4546_v52  ;;  %v2346_v52 = vunpack.i.h.bf16 %v4483_v51  ;;  %v1152_v34 = vmul.f32 %v5282_v55, %v5281_v15  ;;  %v5284_v48 = vld [vmem:[#allocation24_spill] sm:$0xff] }
 0x2ed   :  { %v1977_v24 = vmul.f32 1.442695, %v1952_v17  ;;  %v4667_v38 = vadd.f32 %v4401_v49, %v1874_v45  ;;  %v1809_v33 = vsel %vm3609_vm4, %v1777_v29, 0.0  ;;  %v1444_v17 = vsel %vm1428_vm6, %v4424_v35, %v2354_v36  ;;  %v5288_v35 = vld [vmem:[#allocation146_spill] sm:$0xff] }
 0x2ee   :  { %v1857_v9 = vmul.f32 %v5275_v31, %v1809_v33  ;;  %v1283_v44 = vsel %vm1267_vm7, %v5283_v37, %v2346_v52  ;;  %v1169_v31 = vadd.f32 %v1153_v4, %v1105_v8  ;;  %v1314_v25 = vsel %vm3609_vm4, %v5284_v48, 0.0  ;;  %v5287_v4 = vld [vmem:[#allocation43_spill] sm:$0xff]  ;;  %v1761_v52 = vpop.permute.xlu0 %1760 }
 0x2ef   :  { %2461 = vpow2.f32 %v1977_v24  ;;  %v1954_v22 = vsub.f32 0.0, %v4667_v38  ;;  %v1652_v10 = vpop.permute.xlu1 %1651  ;;  %v1168_v56 = vadd.f32 %v1152_v34, %v1104_v43  ;;  %v1315_v57 = vsel %vm3741_vm10, %v1283_v44, 0.0 }
 0x2f0   :  { %v1680_v51 = vsel %vm1669_vm11, %v1652_v10, %v4507_v27  ;;  %v1474_v27 = vsel %vm3704_vm8, %v1442_v58, 0.0  ;;  %v1280_v8 = vsel %vm1267_vm7, %v4499_v46, %v5277_v19  ;;  %v1476_v24 = vsel %vm3704_vm8, %v1444_v17, 0.0 }
 0x2f1   :  { %v1981_v30 = vmul.f32 1.442695, %v1954_v22  ;;  %v1712_v39 = vadd.f32 %v1680_v51, %v4433_v14  ;;  %v1170_v14 = vadd.f32 %v1154_v6, %v1106_v18  ;;  %v1522_v50 = vmul.f32 %v5286_v32, %v1474_v27 }
 0x2f2   :  { %v1151_v23 = vmul.f32 %v5282_v55, %v5287_v4  ;;  %v1362_v16 = vmul.f32 %v5288_v35, %v1314_v25  ;;  %v1475_v6 = vsel %vm3587_vm2, %v1443_v62, 0.0  ;;  %v1377_v11 = vadd.f32 %v1361_v13, %v1168_v56  ;;  %v1664_v25 = vpop.permute.xlu0 %1663 }
 0x2f3   :  { %2463 = vpow2.f32 %v1981_v30  ;;  %v1873_v45 = vadd.f32 %v1857_v9, %v1712_v39  ;;  %v4701_v20 = vpop.permute.xlu1 %1924  ;;  %v1363_v22 = vmul.f32 %v5288_v35, %v1315_v57  ;;  %v1312_v10 = vsel %vm3609_vm4, %v1280_v8, 0.0  ;;  %v5290_v57 = vld [vmem:[#allocation53_spill] sm:$0xff] }
 0x2f4   :  { %2465 = vpow2.f32 %v1975_v28  ;;  %v1524_v58 = vmul.f32 %v5289_v54, %v1476_v24  ;;  %v1538_v30 = vadd.f32 %v1522_v50, %v1377_v11  ;;  %v1523_v9 = vmul.f32 %v5289_v54, %v1475_v6 }
 0x2f5   :  { %v4711_v29 = vadd.f32 %v4401_v49, %v1873_v45  ;;  %v942_v49 = vadd.f32 %v4560_v63, %v781_v1  ;;  %v1781_v63 = vsel %vm1766_vm9, %v1761_v52, %v4624_v0  ;;  %v1378_v55 = vadd.f32 %v1362_v16, %v1169_v31 }
 0x2f6   :  { %v1441_v34 = vsel %vm1428_vm6, %v4485_v42, %v4511_v41  ;;  %v1379_v45 = vadd.f32 %v1363_v22, %v1170_v14  ;;  %v1360_v48 = vmul.f32 %v5285_v47, %v1312_v10 }
 0x2f7   :  { %v1953_v33 = vsub.f32 0.0, %v4711_v29  ;;  %v2362_v61 = vpop.permute.xlu1 %2361  ;;  %v1103_v17 = vadd.f32 %v4578_v21, %v942_v49  ;;  %v1539_v21 = vadd.f32 %v1523_v9, %v1378_v55 }
 0x2f8   :  { %v2364_v46 = vunpack.i.h.bf16 %v2362_v61  ;;  %v2363_v19 = vunpack.i.l.bf16 %v2362_v61  ;;  %v1540_v56 = vadd.f32 %v1524_v58, %v1379_v45 }
 0x2f9   :  { %v2462_v36 = vpop.eup %2461  ;;  %v1979_v43 = vmul.f32 1.442695, %v1953_v33  ;;  %v1167_v4 = vadd.f32 %v1151_v23, %v1103_v17 }
 0x2fa   :  { %v2000_v51 = vadd.f32 1.0, %v2462_v36  ;;  %v1780_v28 = vsel %vm1766_vm9, %v4585_v60, %v2363_v19  ;;  %v1782_v39 = vsel %vm1766_vm9, %v4624_v0, %v2364_v46  ;;  %v1813_v0 = vsel %vm3609_vm4, %v1781_v63, 0.0 }
 0x2fb   :  { %2467 = vpow2.f32 %v1979_v43  ;;  %v1812_v18 = vsel %vm3741_vm10, %v1780_v28, 0.0  ;;  %v1660_v15 = vpop.permute.xlu1 %1659  ;;  %v1814_v42 = vsel %vm3741_vm10, %v1782_v39, 0.0  ;;  %v1861_v8 = vmul.f32 %v5290_v57, %v1813_v0 }
 0x2fc   :  { %v1683_v1 = vsel %vm1669_vm11, %v1660_v15, %v4657_v3  ;;  %v1860_v37 = vmul.f32 %v4505_v2, %v1812_v18  ;;  %2469 = vrcp.f32 %v2000_v51  ;;  %v1473_v3 = vsel %vm3587_vm2, %v1441_v34, 0.0 }
 0x2fd   :  { %v2464_v44 = vpop.eup %2463  ;;  %v1715_v27 = vadd.f32 %v1683_v1, %v1538_v30  ;;  %v1862_v26 = vmul.f32 %v5290_v57, %v1814_v42  ;;  %v1521_v16 = vmul.f32 %v5286_v32, %v1473_v3  ;;  %v1376_v46 = vadd.f32 %v1360_v48, %v1167_v4  ;;  %v2039_v57 = vld [vmem:[%s4816_s5] sm:$0xff] }
 0x2fe   :  { %v2002_v31 = vadd.f32 1.0, %v2464_v44  ;;  %v2466_v41 = vpop.eup %2465  ;;  %v2501_v4 = vld [vmem:[%s4811_s0] sm:$0xff] }
 0x2ff   :  { %v1876_v13 = vadd.f32 %v1860_v37, %v1715_v27  ;;  %v1666_v62 = vpop.permute.xlu1 %1665  ;;  %v1999_v35 = vadd.f32 1.0, %v2466_v41  ;;  %v1537_v54 = vadd.f32 %v1521_v16, %v1376_v46  ;;  %v2051_v16 = vpop.permute.xlu0 %2050  ;;  %v2503_v46 = vld [vmem:[%s4811_s0 + $0x10] sm:$0xff] }
 0x300   :  { %2471 = vrcp.f32 %v2002_v31  ;;  %v1684_v14 = vsel %vm1669_vm11, %v1664_v25, %v1666_v62  ;;  %v1685_v47 = vsel %vm1669_vm11, %v1666_v62, %v4689_v53 }
 0x301   :  { %v4760_v5 = vadd.f32 %v4534_v59, %v1876_v13  ;;  %v1716_v24 = vadd.f32 %v1684_v14, %v1539_v21  ;;  %v1717_v50 = vadd.f32 %v1685_v47, %v1540_v56  ;;  %2473 = vrcp.f32 %v1999_v35  ;;  %v2040_v14 = vld [vmem:[%s4816_s5 + $0x8] sm:$0xff]  ;;  %s2547_s5 = smov [#allocation3]  }
 0x302   :  { %s2150_s9 = sshll.u32 %s2547_s5, 4  ;;  %s2151_s9 = int_to_ptr.vmem [resolvable:$true] %s2150_s9 }
 0x303   :  { %v1956_v49 = vsub.f32 0.0, %v4760_v5  ;;  %v1877_v52 = vadd.f32 %v1861_v8, %v1716_v24  ;;  %v1878_v33 = vadd.f32 %v1862_v26, %v1717_v50  ;;  %v1755_v61 = vpop.permute.xlu1 %1754  ;;  %v5291_v8 = vmov 0.0   ;;  %s2505_s18 = scalar_lea.vmem %s2151_s9, 512  ;;  %p2510_p1 = scmp.lt.s32.totalorder %s2151_s9, %s2151_s9 }
 0x304   :  { %v1779_v6 = vsel %vm1766_vm9, %v1755_v61, %v4585_v60  ;;  %p2506_p0 = scmp.ne.s32.totalorder %s2151_s9, %s2505_s18  ;;  %p2511_p2 = scmp.lt.s32.totalorder %s2505_s18, %s2505_s18 }
 0x305   :  { %v2468_v53 = vpop.eup %2467  ;;  %v1985_v19 = vmul.f32 1.442695, %v1956_v49  ;;  %v1941_v11 = vadd.f32 %v4701_v20, %v1877_v52  ;;  %v1942_v36 = vadd.f32 %v4701_v20, %v1878_v33  ;;  %v1811_v32 = vsel %vm3609_vm4, %v1779_v6, 0.0  ;;  %v2502_v49 = vld [vmem:[%s4811_s0 + $0x8] sm:$0xff] }
 0x306   :  { %v2001_v23 = vadd.f32 1.0, %v2468_v53  ;;  %v2470_v58 = vpop.eup %2469  ;;  %v1859_v28 = vmul.f32 %v4505_v2, %v1811_v32  ;;  %p2512_p3 = por %p2511_p2, %p2510_p1 }
 0x307   :  { %2475 = vpow2.f32 %v1985_v19  ;;  %v1957_v22 = vsub.f32 0.0, %v1941_v11  ;;  %v1958_v10 = vsub.f32 0.0, %v1942_v36  ;;  %v1658_v43 = vpop.permute.xlu1 %1657  ;;  %v2032_v39 = vmul.f32 %v2470_v58, %v4647_v7 }
 0x308   :  { %2477 = vrcp.f32 %v2001_v23  ;;  %v1682_v60 = vsel %vm1669_vm11, %v1658_v43, %v1660_v15  ;;  %p2513_p4 = pnand %p2512_p3, %p2506_p0 }
 0x309   :  { %v1987_v63 = vmul.f32 1.442695, %v1957_v22  ;;  %v1989_v51 = vmul.f32 1.442695, %v1958_v10  ;;  %v1714_v30 = vadd.f32 %v1682_v60, %v1537_v54 }
 0x30a   :  { %v2472_v20 = vpop.eup %2471 }
 0x30b   :  { %v1875_v9 = vadd.f32 %v1859_v28, %v1714_v30  ;;  %v2034_v12 = vmul.f32 %v2472_v20, %v4667_v38  ;;  %2479 = vpow2.f32 %v1989_v51  ;;  %v2474_v1 = vpop.eup %2473  ;;  %v2046_v47 = vpop.permute.xlu1 %2045 }
 0x30c   :  { %2481 = vpow2.f32 %v1987_v63  ;;  %v2031_v2 = vmul.f32 %v2474_v1, %v4643_v40 }
 0x30d   :  { %v1939_v18 = vadd.f32 %v4534_v59, %v1875_v9  ;;  %v2183_v55 = vpack.c.bf16 %v2034_v12, %v2032_v39 }
 0x30f   :  { %v1955_v34 = vsub.f32 0.0, %v1939_v18  ;;  %2184 = vmatprep.subr.bf16.mxu1 %v2183_v55 }
 0x311   :  { %v2476_v15 = vpop.eup %2475  ;;  %v1983_v37 = vmul.f32 1.442695, %v1955_v34 }
 0x312   :  { %v2478_v44 = vpop.eup %2477  ;;  %v2004_v17 = vadd.f32 1.0, %v2476_v15 }
 0x313   :  { %2483 = vpow2.f32 %v1983_v37  ;;  %v2033_v0 = vmul.f32 %v2478_v44, %v4711_v29 }
 0x314   :  { %2485 = vrcp.f32 %v2004_v17 }
 0x315   :  { %v2185_v7 = vpack.c.bf16 %v2033_v0, %v2031_v2  ;;  %v2480_v27 = vpop.eup %2479 }
 0x316   :  { %v2482_v38 = vpop.eup %2481  ;;  %v2006_v45 = vadd.f32 1.0, %v2480_v27 }
 0x317   :  { %2186 = vmatpush1.bf16.msra.mxu1 %v2185_v7  ;;  %v2005_v59 = vadd.f32 1.0, %v2482_v38 }
 0x318   :  { %2487 = vrcp.f32 %v2006_v45 }
 0x319   :  { %2489 = vrcp.f32 %v2005_v59 }
 0x31d   :  { %v2484_v48 = vpop.eup %2483 }
 0x31e   :  { %v2003_v31 = vadd.f32 1.0, %v2484_v48  ;;  %v2486_v42 = vpop.eup %2485 }
 0x31f   :  { %v2036_v3 = vmul.f32 %v2486_v42, %v4760_v5 }
 0x320   :  { %2491 = vrcp.f32 %v2003_v31 }
 0x322   :  { %v2488_v41 = vpop.eup %2487 }
 0x323   :  { %v2038_v25 = vmul.f32 %v2488_v41, %v1942_v36  ;;  %v2490_v13 = vpop.eup %2489 }
 0x324   :  { %v2037_v21 = vmul.f32 %v2490_v13, %v1941_v11  ;;  %v2504_v11 = vld [vmem:[%s4811_s0 + $0x18] sm:$0xff] }
 0x325   :  { %v2187_v40 = vpack.c.bf16 %v2038_v25, %v2036_v3 }
 0x327   :  { %2188 = vmatprep.subr.bf16.mxu1 %v2187_v40 }
 0x32a   :  { %v2492_v29 = vpop.eup %2491 }
 0x32b   :  { %v2035_v62 = vmul.f32 %v2492_v29, %v1939_v18 }
 0x32d   :  { %v2189_v56 = vpack.c.bf16 %v2037_v21, %v2035_v62 }
 0x32f   :  { %2190 = vmatpush1.bf16.msra.mxu1 %v2189_v56 }
 0x332   :  { %2169 = vmatmul.mubr.msk.f32.vlgmr.msra.gmra.mrb[0].mxu1 %vm2053_vm12, %v2039_v57 }
 0x333   :  { %2130 = vmatprep.mubr.f32.mxu1 %v5291_v8 }
 0x336   :  { %2170 = vmatmul.mubr.msk.f32.gmra.mrb[2].mxu1 %vm2053_vm12, %v2040_v14 }
 0x405   :  { %v2126_v5 = vpop.f32.mrb[0].mxu1 }
 0x406   :  { %v2127_v24 = vadd.f32 %v2126_v5, %v2046_v47  ;;  %v2128_v50 = vpop.f32.mrb[1].mxu1 }
 0x407   :  { %v2129_v26 = vadd.f32 %v2128_v50, %v2046_v47 }
 0x408   :  { %v2137_v35 = vadd.f32 %v2501_v4, %v2127_v24 }
 0x409   :  { %v2138_v52 = vadd.f32 %v2502_v49, %v2129_v26  ;;  %v2132_v33 = vpop.f32.mrb[2].mxu1 }
 0x40a   :  { %2141 = vst [vmem:[#allocation3] sm:$0xff] %v2137_v35  ;;  %v2133_v61 = vadd.f32 %v2132_v33, %v2051_v16  ;;  %v2134_v6 = vpop.f32.mrb[3].mxu1 }
 0x40b   :  { %2142 = vst [vmem:[#allocation3 + $0x8] sm:$0xff] %v2138_v52  ;;  %v2135_v53 = vadd.f32 %v2134_v6, %v2051_v16 }
 0x40c   :  { %v2139_v19 = vadd.f32 %v2503_v46, %v2133_v61 }
 0x40d   :  { %v2140_v36 = vadd.f32 %v2504_v11, %v2135_v53 }
 0x40e   :  { %2143 = vst [vmem:[#allocation3 + $0x10] sm:$0xff] %v2139_v19 }
 0x40f   :  { %2144 = vst [vmem:[#allocation3 + $0x18] sm:$0xff] %v2140_v36 }
 0x410   :  { %2516 = shalt.err (!%p2513_p4)
}
 0x411   :  { %s2517_s21 = scalar_lea.hbm %s4818_s7, 512 }
 0x412   :  { %p2518_p5 = scmp.ne.s32.totalorder %s4818_s7, %s2517_s21  ;;  %p2521_p6 = scmp.lt.u32.totalorder %s2517_s21, %s4818_s7 }
 0x414   :  { %p2523_p7 = pnand %p2521_p6, %p2518_p5 }
 0x416   :  { %2526 = shalt.err (!%p2523_p7)
}
 0x417   :  { %s2548_s23 = smov 256  }
 0x418   :  { %2156 = dma.vmem_to_hbm [thread:$0]  %s2151_s9, 512, %s4818_s7, [#allocation4], %s2548_s23, %s2548_s23, %s2538_s12  }
 0x419   :  { %2527 = dma.done.wait [#allocation4], 512  }
 0x41a   :  { %2528 = vsyncadd [#allocation4], 4294966784 }
 0x41b   :  { %2160 = vsyncpa [#allocation4], 1 }

</bundles_post_ra>
